<compile_context>
chip_gen: v7x
topology: tpu7x:2x2x1
jax: 0.10.0
libtpu: 0.0.40
codegen_flags: <defaults>
</compile_context>

<pallas_src>
import math
import numpy as np
import jax
import jax.numpy as jnp
from jax.experimental import pallas as pl
from jax.experimental.pallas import tpu as pltpu  # noqa: F401  (TPU backend assumed)

# Small synthetic config consistent with the module's __init__ signature.
D_MODEL = 32
D_FFT = 64
LAYERS = 4
HEADS = 1            # module default: single-head attention
ENC_VOCAB = 40
DEC_VOCAB = 48
V_PAD = 128          # lane-dense padded width (fc_out / all packed weight rows)
LN_EPS = 1e-5
NEG_INF = -1e30

# Packed weight-slab layout, per layer (all rows 128 lanes wide, bf16):
#   rows [0 , D )      : [ wq*1/sqrt(D) | wk | wv | 0 ]
#   rows [D , 2D)      : [ wo | 0 ]
#   rows [2D, 3D)      : [ w1 | 0 ]            (w1 is (D, F), F=64)
#   rows [3D, 3D+128)  : w2 zero-padded to (128, 128) (rows 0:F, cols 0:D used)
# after the L layers     : fc_out weight zero-padded to (D, 128)
W_RPL = 3 * D_MODEL + V_PAD          # 224 rows per layer
# Packed bias-slab layout, per layer (f32, 128 lanes wide):
#   row 0: [ bq*1/sqrt(D) | bk | bv | 0 ]
#   row 1: [ bo | bb2 | g1 | be1 ]
#   row 2: [ g2 | be2 | 0 | 0 ]
#   row 3: [ b1 (64 lanes) | 0 ]
# after the L layers: row [gf | bf | 0 | 0], then row [bout (48 lanes) | 0]
B_RPL = 4


def _layernorm(y, g, b):
    # one-pass mean / variance (single pair of cross-lane reductions).
    # NOTE: E[x^2]-E[x]^2 can cancel catastrophically for huge means; fine at
    # these scales / tolerances.
    mu = jnp.mean(y, axis=-1, keepdims=True)
    ms = jnp.mean(y * y, axis=-1, keepdims=True)
    var = ms - mu * mu
    return (y - mu) * jax.lax.rsqrt(var + LN_EPS) * g + b


def encoder_kernel(x_ref, mask_ref, w_ref, b_ref, out_ref):
    """Whole (flattened) batch in one gridless invocation.

    x_ref    : (N, D)  f32   embedded + positionally-encoded tokens, N = B*T
    mask_ref : (N, N)  f32   additive mask: block-diagonal + key padding
    w_ref    : (L*W_RPL + D, 128) bf16  packed lane-dense weight slab
    b_ref    : (L*B_RPL + 2, 128) f32   packed lane-dense bias / LN-gain slab
    out_ref  : (N, V_PAD) f32 lane-dense logits (first DEC_VOCAB lanes valid)
    """
    N, D = x_ref.shape
    L = LAYERS

    x = x_ref[...]                        # (N, D) f32 residual stream
    add_mask = mask_ref[...]              # (N, N) f32
    bias = b_ref[...]                     # (L*B_RPL + 2, 128) f32

    for l in range(L):                    # static, unrolled encoder layers
        wb = l * W_RPL
        bb = l * B_RPL
        w_qkv = w_ref[wb:wb + D, :]                    # (D, 128) bf16
        w_o = w_ref[wb + D:wb + 2 * D, :]              # (D, 128) bf16
        w_1 = w_ref[wb + 2 * D:wb + 3 * D, :]          # (D, 128) bf16
        w_2 = w_ref[wb + 3 * D:wb + W_RPL, :]          # (128, 128) bf16

        # --- single-head self-attention over all B*T rows at once ---
        xb = x.astype(jnp.bfloat16)
        qkv = jnp.dot(xb, w_qkv, preferred_element_type=jnp.float32)
        qkv = qkv + bias[bb:bb + 1, :]                 # full-width bias add
        q = qkv[:, 0:D]
        k = qkv[:, D:2 * D]
        v = qkv[:, 2 * D:3 * D]

        # contract last dims directly (no explicit transpose of k); f32 for
        # accuracy of the numerically sensitive attention path.
        scores = jax.lax.dot_general(
            q, k, (((1,), (1,)), ((), ())),
            preferred_element_type=jnp.float32)        # (N, N)
        scores = scores + add_mask                     # cross-seq + pad keys

        m = jnp.max(scores, axis=-1, keepdims=True)
        e = jnp.exp(scores - m)                        # masked entries -> 0
        inv_den = pl.reciprocal(jnp.sum(e, axis=-1, keepdims=True),
                                approx=True)
        attn = e * inv_den
        ctx = jnp.dot(attn, v, preferred_element_type=jnp.float32)   # (N, D)

        att = jnp.dot(ctx.astype(jnp.bfloat16), w_o,
                      preferred_element_type=jnp.float32)[:, 0:D]
        att = att + bias[bb + 1:bb + 2, 0:D]                          # + bo
        # post-norm residual (PyTorch TransformerEncoderLayer default)
        x = _layernorm(x + att,
                       bias[bb + 1:bb + 2, 2 * D:3 * D],              # g1
                       bias[bb + 1:bb + 2, 3 * D:4 * D])              # be1

        # --- position-wise feed-forward, relu activation ---
        h = jnp.dot(x.astype(jnp.bfloat16), w_1,
                    preferred_element_type=jnp.float32)               # (N,128)
        h = jnp.maximum(h + bias[bb + 3:bb + 4, :], 0.0)  # pad lanes stay 0
        ffn = jnp.dot(h.astype(jnp.bfloat16), w_2,
                      preferred_element_type=jnp.float32)[:, 0:D]
        ffn = ffn + bias[bb + 1:bb + 2, D:2 * D]                      # + bb2
        x = _layernorm(x + ffn,
                       bias[bb + 2:bb + 3, 0:D],                      # g2
                       bias[bb + 2:bb + 3, D:2 * D])                  # be2

    # final encoder LayerNorm (`encoder_norm`) + fc_out (lane-dense write)
    fb = L * B_RPL
    x = _layernorm(x, bias[fb:fb + 1, 0:D], bias[fb:fb + 1, D:2 * D])
    w_out = w_ref[L * W_RPL:L * W_RPL + D, :]
    out_ref[...] = (jnp.dot(x.astype(jnp.bfloat16), w_out,
                            preferred_element_type=jnp.float32)
                    + bias[fb + 1:fb + 2, :])


def positional_encoding(t, d_model):
    pos = jnp.arange(t, dtype=jnp.float32)[:, None]
    div = jnp.exp(jnp.arange(0, d_model, 2, dtype=jnp.float32)
                  * (-math.log(10000.0) / d_model))
    pe = jnp.zeros((t, d_model), jnp.float32)
    pe = pe.at[:, 0::2].set(jnp.sin(pos * div))
    pe = pe.at[:, 1::2].set(jnp.cos(pos * div))
    return pe


def init_params(key):
    keys = jax.random.split(key, 24)
    ki = iter(keys)

    def w(shape, s=0.1):
        return jax.random.normal(next(ki), shape, dtype=jnp.float32) * s

    p = {}
    p['emb'] = w((ENC_VOCAB, D_MODEL), 0.3)
    p['pos_scale'] = jnp.float32(1.0)      # nn.Parameter(torch.ones(1))
    # per-layer stacked weights; linear weights stored as (in, out)
    p['wq'] = w((LAYERS, D_MODEL, D_MODEL))
    p['bq'] = w((LAYERS, 1, D_MODEL), 0.02)
    p['wk'] = w((LAYERS, D_MODEL, D_MODEL))
    p['bk'] = w((LAYERS, 1, D_MODEL), 0.02)
    p['wv'] = w((LAYERS, D_MODEL, D_MODEL))
    p['bv'] = w((LAYERS, 1, D_MODEL), 0.02)
    p['wo'] = w((LAYERS, D_MODEL, D_MODEL))
    p['bo'] = w((LAYERS, 1, D_MODEL), 0.02)
    p['g1'] = 1.0 + w((LAYERS, 1, D_MODEL), 0.02)
    p['be1'] = w((LAYERS, 1, D_MODEL), 0.02)
    p['w1'] = w((LAYERS, D_MODEL, D_FFT))
    p['bb1'] = w((LAYERS, 1, D_FFT), 0.02)
    p['w2'] = w((LAYERS, D_FFT, D_MODEL))
    p['bb2'] = w((LAYERS, 1, D_MODEL), 0.02)
    p['g2'] = 1.0 + w((LAYERS, 1, D_MODEL), 0.02)
    p['be2'] = w((LAYERS, 1, D_MODEL), 0.02)
    # final encoder norm + fc_out
    p['gf'] = 1.0 + w((1, D_MODEL), 0.02)
    p['bf'] = w((1, D_MODEL), 0.02)
    p['wout'] = w((D_MODEL, DEC_VOCAB))
    p['bout'] = w((1, DEC_VOCAB), 0.02)
    return p


def pack_params(params, max_len=64):
    """One-time, load-time packing of all weights into two lane-dense slabs."""
    D, F, L, V = D_MODEL, D_FFT, LAYERS, DEC_VOCAB
    scale = 1.0 / math.sqrt(D)            # folded into wq / bq (q-only: safe)

    W = np.zeros((L * W_RPL + D, V_PAD), np.float32)
    Bv = np.zeros((L * B_RPL + 2, V_PAD), np.float32)
    for l in range(L):
        wb = l * W_RPL
        bb = l * B_RPL
        W[wb:wb + D, 0:D] = np.asarray(params['wq'][l]) * scale
        W[wb:wb + D, D:2 * D] = np.asarray(params['wk'][l])
        W[wb:wb + D, 2 * D:3 * D] = np.asarray(params['wv'][l])
        W[wb + D:wb + 2 * D, 0:D] = np.asarray(params['wo'][l])
        W[wb + 2 * D:wb + 3 * D, 0:F] = np.asarray(params['w1'][l])
        W[wb + 3 * D:wb + 3 * D + F, 0:D] = np.asarray(params['w2'][l])

        Bv[bb, 0:D] = np.asarray(params['bq'][l, 0]) * scale
        Bv[bb, D:2 * D] = np.asarray(params['bk'][l, 0])
        Bv[bb, 2 * D:3 * D] = np.asarray(params['bv'][l, 0])
        Bv[bb + 1, 0:D] = np.asarray(params['bo'][l, 0])
        Bv[bb + 1, D:2 * D] = np.asarray(params['bb2'][l, 0])
        Bv[bb + 1, 2 * D:3 * D] = np.asarray(params['g1'][l, 0])
        Bv[bb + 1, 3 * D:4 * D] = np.asarray(params['be1'][l, 0])
        Bv[bb + 2, 0:D] = np.asarray(params['g2'][l, 0])
        Bv[bb + 2, D:2 * D] = np.asarray(params['be2'][l, 0])
        Bv[bb + 3, 0:F] = np.asarray(params['bb1'][l, 0])

    W[L * W_RPL:L * W_RPL + D, 0:V] = np.asarray(params['wout'])
    fb = L * B_RPL
    Bv[fb, 0:D] = np.asarray(params['gf'][0])
    Bv[fb, D:2 * D] = np.asarray(params['bf'][0])
    Bv[fb + 1, 0:V] = np.asarray(params['bout'][0])

    pe = np.asarray(positional_encoding(max_len, D)) * float(params['pos_scale'])
    return {'emb': params['emb'],
            'pe': jnp.asarray(pe, jnp.float32),          # pos_scale pre-folded
            'W': jnp.asarray(W, jnp.bfloat16),           # bf16 MXU operands
            'B': jnp.asarray(Bv, jnp.float32)}


def forward_transformer(tokens, packed):
    """Equivalent of ForwardTransformer.forward({'text': tokens}) (eval mode)."""
    B, T = tokens.shape
    N = B * T

    # glue: embedding lookup + (pre-scaled) positional encoding; dropout no-op
    x = packed['emb'][tokens] + packed['pe'][:T]
    x = x.reshape(N, D_MODEL).astype(jnp.float32)

    # Additive attention mask over the flattened B*T rows: block-diagonal
    # (no cross-sequence attention) + _make_len_mask key padding (token == 0).
    # NOTE: a fully padded sequence would get uniform attention here whereas
    # PyTorch would produce NaN — harmless edge case for inference.
    tok = tokens.reshape(N)
    seq = jnp.arange(N, dtype=jnp.int32) // T
    valid = (seq[:, None] == seq[None, :]) & (tok != 0)[None, :]
    add_mask = jnp.where(valid, 0.0, NEG_INF).astype(jnp.float32)    # (N, N)

    # Gridless pallas_call: whole arrays resident in VMEM (~260 KB total),
    # no pipeline bookkeeping, 4 input DMAs.
    # TODO(synk): for large batches on v7x, add a row-block grid axis marked
    # "parallel" so work is sharded across the 2 TensorCores per chip.
    out_pad = pl.pallas_call(
        encoder_kernel,
        out_shape=jax.ShapeDtypeStruct((N, V_PAD), jnp.float32),
    )(x, add_mask, packed['W'], packed['B'])

    return out_pad.reshape(B, T, V_PAD)[:, :, :DEC_VOCAB]   # drop lane padding


def reference_forward(tokens, params):
    """Pure-JAX reference mirroring the PyTorch semantics (eval mode)."""
    B, T = tokens.shape
    x = params['emb'][tokens]
    x = x + params['pos_scale'] * positional_encoding(T, D_MODEL)[None]
    add_mask = jnp.where(tokens == 0, NEG_INF, 0.0)[:, None, :]
    scale = 1.0 / math.sqrt(D_MODEL)

    def ln(y, g, b):
        mu = jnp.mean(y, axis=-1, keepdims=True)
        var = jnp.mean((y - mu) ** 2, axis=-1, keepdims=True)
        return (y - mu) * jax.lax.rsqrt(var + LN_EPS) * g + b

    for l in range(LAYERS):
        q = x @ params['wq'][l] + params['bq'][l]
        k = x @ params['wk'][l] + params['bk'][l]
        v = x @ params['wv'][l] + params['bv'][l]
        scores = jnp.einsum('btd,bsd->bts', q, k) * scale + add_mask
        attn = jax.nn.softmax(scores, axis=-1)
        ctx = jnp.einsum('bts,bsd->btd', attn, v) @ params['wo'][l] + params['bo'][l]
        x = ln(x + ctx, params['g1'][l], params['be1'][l])
        h = jax.nn.relu(x @ params['w1'][l] + params['bb1'][l])
        h = h @ params['w2'][l] + params['bb2'][l]
        x = ln(x + h, params['g2'][l], params['be2'][l])

    x = ln(x, params['gf'], params['bf'])
    return x @ params['wout'] + params['bout']


if __name__ == "__main__":
    key = jax.random.PRNGKey(0)
    pkey, tkey = jax.random.split(key)
    params = init_params(pkey)
    packed = pack_params(params)           # one-time, model-load-time packing

    B, T = 2, 8
    tokens = jax.random.randint(tkey, (B, T), 1, ENC_VOCAB, dtype=jnp.int32)
    tokens = tokens.at[1, 5:].set(0)       # pad tail of second sequence

    fwd = jax.jit(forward_transformer)
    out = jax.block_until_ready(fwd(tokens, packed))

    ref = reference_forward(tokens, params)
    assert out.shape == (B, T, DEC_VOCAB)
    np.testing.assert_allclose(np.asarray(out), np.asarray(ref),
                               rtol=5e-2, atol=5e-2)
    assert np.isfinite(np.asarray(out)).all()
    print("KERNEL_OK")
</pallas_src>

<mosaic_0001>
module attributes {stable_mosaic.version = 11 : i64} {
  func.func @encoder_kernel(%arg0: memref<16x32xf32, #tpu.memory_space<vmem>>, %arg1: memref<16x16xf32, #tpu.memory_space<vmem>>, %arg2: memref<928x128xbf16, #tpu.memory_space<vmem>>, %arg3: memref<18x128xf32, #tpu.memory_space<vmem>>, %arg4: memref<16x128xf32, #tpu.memory_space<vmem>>) attributes {dimension_semantics = [], scalar_prefetch = 0 : i64, scratch_operands = 0 : i64, tpu.core_type = #tpu.core_type<tc>} {
    %c0 = arith.constant 0 : index
    %c0_0 = arith.constant 0 : index
    %0 = vector.load %arg0[%c0, %c0_0] : memref<16x32xf32, #tpu.memory_space<vmem>>, vector<16x32xf32>
    %c0_1 = arith.constant 0 : index
    %c0_2 = arith.constant 0 : index
    %1 = vector.load %arg1[%c0_1, %c0_2] : memref<16x16xf32, #tpu.memory_space<vmem>>, vector<16x16xf32>
    %c0_3 = arith.constant 0 : index
    %c0_4 = arith.constant 0 : index
    %2 = vector.load %arg3[%c0_3, %c0_4] : memref<18x128xf32, #tpu.memory_space<vmem>>, vector<18x128xf32>
    %c0_5 = arith.constant 0 : index
    %c0_6 = arith.constant 0 : index
    %3 = vector.load %arg2[%c0_5, %c0_6] : memref<928x128xbf16, #tpu.memory_space<vmem>>, vector<32x128xbf16>
    %c32 = arith.constant 32 : index
    %c0_7 = arith.constant 0 : index
    %4 = vector.load %arg2[%c32, %c0_7] : memref<928x128xbf16, #tpu.memory_space<vmem>>, vector<32x128xbf16>
    %c64 = arith.constant 64 : index
    %c0_8 = arith.constant 0 : index
    %5 = vector.load %arg2[%c64, %c0_8] : memref<928x128xbf16, #tpu.memory_space<vmem>>, vector<32x128xbf16>
    %c96 = arith.constant 96 : index
    %c0_9 = arith.constant 0 : index
    %6 = vector.load %arg2[%c96, %c0_9] : memref<928x128xbf16, #tpu.memory_space<vmem>>, vector<128x128xbf16>
    %7 = arith.truncf %0 : vector<16x32xf32> to vector<16x32xbf16>
    %cst = arith.constant dense<0.000000e+00> : vector<16x128xf32>
    %8 = tpu.matmul %7, %3, %cst {dimension_numbers = #tpu.dot_dimension_numbers<[1], [0], [0], [1], [0, 0, 1, 1], [], []>} : vector<16x32xbf16>, vector<32x128xbf16>, vector<16x128xf32> -> vector<16x128xf32>
    %9 = vector.extract_strided_slice %2 {offsets = [0, 0], sizes = [1, 128], strides = [1, 1]} : vector<18x128xf32> to vector<1x128xf32>
    %10 = vector.broadcast %9 : vector<1x128xf32> to vector<16x128xf32>
    %11 = arith.addf %8, %10 : vector<16x128xf32>
    %12 = vector.extract_strided_slice %11 {offsets = [0, 0], sizes = [16, 32], strides = [1, 1]} : vector<16x128xf32> to vector<16x32xf32>
    %13 = vector.extract_strided_slice %11 {offsets = [0, 32], sizes = [16, 32], strides = [1, 1]} : vector<16x128xf32> to vector<16x32xf32>
    %14 = vector.extract_strided_slice %11 {offsets = [0, 64], sizes = [16, 32], strides = [1, 1]} : vector<16x128xf32> to vector<16x32xf32>
    %cst_10 = arith.constant dense<0.000000e+00> : vector<16x16xf32>
    %15 = tpu.matmul %12, %13, %cst_10 {dimension_numbers = #tpu.dot_dimension_numbers<[1], [1], [0], [0], [0, 0, 1, 0], [], []>} : vector<16x32xf32>, vector<16x32xf32>, vector<16x16xf32> -> vector<16x16xf32>
    %16 = arith.addf %15, %1 : vector<16x16xf32>
    %cst_11 = arith.constant dense<0xFF800000> : vector<16xf32>
    %17 = vector.multi_reduction <maximumf>, %16, %cst_11 [1] : vector<16x16xf32> to vector<16xf32>
    %18 = vector.shape_cast %17 : vector<16xf32> to vector<16x1xf32>
    %19 = vector.broadcast %18 : vector<16x1xf32> to vector<16x16xf32>
    %20 = arith.subf %16, %19 : vector<16x16xf32>
    %21 = math.exp %20 : vector<16x16xf32>
    %cst_12 = arith.constant dense<0.000000e+00> : vector<16xf32>
    %22 = vector.multi_reduction <add>, %21, %cst_12 [1] : vector<16x16xf32> to vector<16xf32>
    %23 = vector.shape_cast %22 : vector<16xf32> to vector<16x1xf32>
    %24 = tpu.reciprocal %23 {approx = true} : vector<16x1xf32> -> vector<16x1xf32>
    %25 = vector.broadcast %24 : vector<16x1xf32> to vector<16x16xf32>
    %26 = arith.mulf %21, %25 : vector<16x16xf32>
    %cst_13 = arith.constant dense<0.000000e+00> : vector<16x32xf32>
    %27 = tpu.matmul %26, %14, %cst_13 {dimension_numbers = #tpu.dot_dimension_numbers<[1], [0], [0], [1], [0, 0, 1, 1], [], []>} : vector<16x16xf32>, vector<16x32xf32>, vector<16x32xf32> -> vector<16x32xf32>
    %28 = arith.truncf %27 : vector<16x32xf32> to vector<16x32xbf16>
    %cst_14 = arith.constant dense<0.000000e+00> : vector<16x128xf32>
    %29 = tpu.matmul %28, %4, %cst_14 {dimension_numbers = #tpu.dot_dimension_numbers<[1], [0], [0], [1], [0, 0, 1, 1], [], []>} : vector<16x32xbf16>, vector<32x128xbf16>, vector<16x128xf32> -> vector<16x128xf32>
    %30 = vector.extract_strided_slice %29 {offsets = [0, 0], sizes = [16, 32], strides = [1, 1]} : vector<16x128xf32> to vector<16x32xf32>
    %31 = vector.extract_strided_slice %2 {offsets = [1, 0], sizes = [1, 32], strides = [1, 1]} : vector<18x128xf32> to vector<1x32xf32>
    %32 = vector.broadcast %31 : vector<1x32xf32> to vector<16x32xf32>
    %33 = arith.addf %30, %32 : vector<16x32xf32>
    %34 = arith.addf %0, %33 : vector<16x32xf32>
    %35 = vector.extract_strided_slice %2 {offsets = [1, 64], sizes = [1, 32], strides = [1, 1]} : vector<18x128xf32> to vector<1x32xf32>
    %36 = vector.extract_strided_slice %2 {offsets = [1, 96], sizes = [1, 32], strides = [1, 1]} : vector<18x128xf32> to vector<1x32xf32>
    %cst_15 = arith.constant dense<0.000000e+00> : vector<16xf32>
    %37 = vector.multi_reduction <add>, %34, %cst_15 [1] : vector<16x32xf32> to vector<16xf32>
    %38 = vector.shape_cast %37 : vector<16xf32> to vector<16x1xf32>
    %cst_16 = arith.constant 3.200000e+01 : f32
    %39 = vector.broadcast %cst_16 : f32 to vector<16x1xf32>
    %40 = arith.divf %38, %39 : vector<16x1xf32>
    %41 = arith.mulf %34, %34 : vector<16x32xf32>
    %cst_17 = arith.constant dense<0.000000e+00> : vector<16xf32>
    %42 = vector.multi_reduction <add>, %41, %cst_17 [1] : vector<16x32xf32> to vector<16xf32>
    %43 = vector.shape_cast %42 : vector<16xf32> to vector<16x1xf32>
    %cst_18 = arith.constant 3.200000e+01 : f32
    %44 = vector.broadcast %cst_18 : f32 to vector<16x1xf32>
    %45 = arith.divf %43, %44 : vector<16x1xf32>
    %46 = arith.mulf %40, %40 : vector<16x1xf32>
    %47 = arith.subf %45, %46 : vector<16x1xf32>
    %48 = vector.broadcast %40 : vector<16x1xf32> to vector<16x32xf32>
    %49 = arith.subf %34, %48 : vector<16x32xf32>
    %cst_19 = arith.constant 9.99999974E-6 : f32
    %50 = vector.broadcast %cst_19 : f32 to vector<16x1xf32>
    %51 = arith.addf %47, %50 : vector<16x1xf32>
    %52 = math.rsqrt %51 : vector<16x1xf32>
    %53 = vector.broadcast %52 : vector<16x1xf32> to vector<16x32xf32>
    %54 = arith.mulf %49, %53 : vector<16x32xf32>
    %55 = vector.broadcast %35 : vector<1x32xf32> to vector<16x32xf32>
    %56 = arith.mulf %54, %55 : vector<16x32xf32>
    %57 = vector.broadcast %36 : vector<1x32xf32> to vector<16x32xf32>
    %58 = arith.addf %56, %57 : vector<16x32xf32>
    %59 = arith.truncf %58 : vector<16x32xf32> to vector<16x32xbf16>
    %cst_20 = arith.constant dense<0.000000e+00> : vector<16x128xf32>
    %60 = tpu.matmul %59, %5, %cst_20 {dimension_numbers = #tpu.dot_dimension_numbers<[1], [0], [0], [1], [0, 0, 1, 1], [], []>} : vector<16x32xbf16>, vector<32x128xbf16>, vector<16x128xf32> -> vector<16x128xf32>
    %61 = vector.extract_strided_slice %2 {offsets = [3, 0], sizes = [1, 128], strides = [1, 1]} : vector<18x128xf32> to vector<1x128xf32>
    %62 = vector.broadcast %61 : vector<1x128xf32> to vector<16x128xf32>
    %63 = arith.addf %60, %62 : vector<16x128xf32>
    %cst_21 = arith.constant 0.000000e+00 : f32
    %64 = vector.broadcast %cst_21 : f32 to vector<16x128xf32>
    %65 = arith.maximumf %63, %64 : vector<16x128xf32>
    %66 = arith.truncf %65 : vector<16x128xf32> to vector<16x128xbf16>
    %cst_22 = arith.constant dense<0.000000e+00> : vector<16x128xf32>
    %67 = tpu.matmul %66, %6, %cst_22 {dimension_numbers = #tpu.dot_dimension_numbers<[1], [0], [0], [1], [0, 0, 1, 1], [], []>} : vector<16x128xbf16>, vector<128x128xbf16>, vector<16x128xf32> -> vector<16x128xf32>
    %68 = vector.extract_strided_slice %67 {offsets = [0, 0], sizes = [16, 32], strides = [1, 1]} : vector<16x128xf32> to vector<16x32xf32>
    %69 = vector.extract_strided_slice %2 {offsets = [1, 32], sizes = [1, 32], strides = [1, 1]} : vector<18x128xf32> to vector<1x32xf32>
    %70 = vector.broadcast %69 : vector<1x32xf32> to vector<16x32xf32>
    %71 = arith.addf %68, %70 : vector<16x32xf32>
    %72 = arith.addf %58, %71 : vector<16x32xf32>
    %73 = vector.extract_strided_slice %2 {offsets = [2, 0], sizes = [1, 32], strides = [1, 1]} : vector<18x128xf32> to vector<1x32xf32>
    %74 = vector.extract_strided_slice %2 {offsets = [2, 32], sizes = [1, 32], strides = [1, 1]} : vector<18x128xf32> to vector<1x32xf32>
    %cst_23 = arith.constant dense<0.000000e+00> : vector<16xf32>
    %75 = vector.multi_reduction <add>, %72, %cst_23 [1] : vector<16x32xf32> to vector<16xf32>
    %76 = vector.shape_cast %75 : vector<16xf32> to vector<16x1xf32>
    %cst_24 = arith.constant 3.200000e+01 : f32
    %77 = vector.broadcast %cst_24 : f32 to vector<16x1xf32>
    %78 = arith.divf %76, %77 : vector<16x1xf32>
    %79 = arith.mulf %72, %72 : vector<16x32xf32>
    %cst_25 = arith.constant dense<0.000000e+00> : vector<16xf32>
    %80 = vector.multi_reduction <add>, %79, %cst_25 [1] : vector<16x32xf32> to vector<16xf32>
    %81 = vector.shape_cast %80 : vector<16xf32> to vector<16x1xf32>
    %cst_26 = arith.constant 3.200000e+01 : f32
    %82 = vector.broadcast %cst_26 : f32 to vector<16x1xf32>
    %83 = arith.divf %81, %82 : vector<16x1xf32>
    %84 = arith.mulf %78, %78 : vector<16x1xf32>
    %85 = arith.subf %83, %84 : vector<16x1xf32>
    %86 = vector.broadcast %78 : vector<16x1xf32> to vector<16x32xf32>
    %87 = arith.subf %72, %86 : vector<16x32xf32>
    %cst_27 = arith.constant 9.99999974E-6 : f32
    %88 = vector.broadcast %cst_27 : f32 to vector<16x1xf32>
    %89 = arith.addf %85, %88 : vector<16x1xf32>
    %90 = math.rsqrt %89 : vector<16x1xf32>
    %91 = vector.broadcast %90 : vector<16x1xf32> to vector<16x32xf32>
    %92 = arith.mulf %87, %91 : vector<16x32xf32>
    %93 = vector.broadcast %73 : vector<1x32xf32> to vector<16x32xf32>
    %94 = arith.mulf %92, %93 : vector<16x32xf32>
    %95 = vector.broadcast %74 : vector<1x32xf32> to vector<16x32xf32>
    %96 = arith.addf %94, %95 : vector<16x32xf32>
    %c224 = arith.constant 224 : index
    %c0_28 = arith.constant 0 : index
    %97 = vector.load %arg2[%c224, %c0_28] : memref<928x128xbf16, #tpu.memory_space<vmem>>, vector<32x128xbf16>
    %c256 = arith.constant 256 : index
    %c0_29 = arith.constant 0 : index
    %98 = vector.load %arg2[%c256, %c0_29] : memref<928x128xbf16, #tpu.memory_space<vmem>>, vector<32x128xbf16>
    %c288 = arith.constant 288 : index
    %c0_30 = arith.constant 0 : index
    %99 = vector.load %arg2[%c288, %c0_30] : memref<928x128xbf16, #tpu.memory_space<vmem>>, vector<32x128xbf16>
    %c320 = arith.constant 320 : index
    %c0_31 = arith.constant 0 : index
    %100 = vector.load %arg2[%c320, %c0_31] : memref<928x128xbf16, #tpu.memory_space<vmem>>, vector<128x128xbf16>
    %101 = arith.truncf %96 : vector<16x32xf32> to vector<16x32xbf16>
    %cst_32 = arith.constant dense<0.000000e+00> : vector<16x128xf32>
    %102 = tpu.matmul %101, %97, %cst_32 {dimension_numbers = #tpu.dot_dimension_numbers<[1], [0], [0], [1], [0, 0, 1, 1], [], []>} : vector<16x32xbf16>, vector<32x128xbf16>, vector<16x128xf32> -> vector<16x128xf32>
    %103 = vector.extract_strided_slice %2 {offsets = [4, 0], sizes = [1, 128], strides = [1, 1]} : vector<18x128xf32> to vector<1x128xf32>
    %104 = vector.broadcast %103 : vector<1x128xf32> to vector<16x128xf32>
    %105 = arith.addf %102, %104 : vector<16x128xf32>
    %106 = vector.extract_strided_slice %105 {offsets = [0, 0], sizes = [16, 32], strides = [1, 1]} : vector<16x128xf32> to vector<16x32xf32>
    %107 = vector.extract_strided_slice %105 {offsets = [0, 32], sizes = [16, 32], strides = [1, 1]} : vector<16x128xf32> to vector<16x32xf32>
    %108 = vector.extract_strided_slice %105 {offsets = [0, 64], sizes = [16, 32], strides = [1, 1]} : vector<16x128xf32> to vector<16x32xf32>
    %cst_33 = arith.constant dense<0.000000e+00> : vector<16x16xf32>
    %109 = tpu.matmul %106, %107, %cst_33 {dimension_numbers = #tpu.dot_dimension_numbers<[1], [1], [0], [0], [0, 0, 1, 0], [], []>} : vector<16x32xf32>, vector<16x32xf32>, vector<16x16xf32> -> vector<16x16xf32>
    %110 = arith.addf %109, %1 : vector<16x16xf32>
    %cst_34 = arith.constant dense<0xFF800000> : vector<16xf32>
    %111 = vector.multi_reduction <maximumf>, %110, %cst_34 [1] : vector<16x16xf32> to vector<16xf32>
    %112 = vector.shape_cast %111 : vector<16xf32> to vector<16x1xf32>
    %113 = vector.broadcast %112 : vector<16x1xf32> to vector<16x16xf32>
    %114 = arith.subf %110, %113 : vector<16x16xf32>
    %115 = math.exp %114 : vector<16x16xf32>
    %cst_35 = arith.constant dense<0.000000e+00> : vector<16xf32>
    %116 = vector.multi_reduction <add>, %115, %cst_35 [1] : vector<16x16xf32> to vector<16xf32>
    %117 = vector.shape_cast %116 : vector<16xf32> to vector<16x1xf32>
    %118 = tpu.reciprocal %117 {approx = true} : vector<16x1xf32> -> vector<16x1xf32>
    %119 = vector.broadcast %118 : vector<16x1xf32> to vector<16x16xf32>
    %120 = arith.mulf %115, %119 : vector<16x16xf32>
    %cst_36 = arith.constant dense<0.000000e+00> : vector<16x32xf32>
    %121 = tpu.matmul %120, %108, %cst_36 {dimension_numbers = #tpu.dot_dimension_numbers<[1], [0], [0], [1], [0, 0, 1, 1], [], []>} : vector<16x16xf32>, vector<16x32xf32>, vector<16x32xf32> -> vector<16x32xf32>
    %122 = arith.truncf %121 : vector<16x32xf32> to vector<16x32xbf16>
    %cst_37 = arith.constant dense<0.000000e+00> : vector<16x128xf32>
    %123 = tpu.matmul %122, %98, %cst_37 {dimension_numbers = #tpu.dot_dimension_numbers<[1], [0], [0], [1], [0, 0, 1, 1], [], []>} : vector<16x32xbf16>, vector<32x128xbf16>, vector<16x128xf32> -> vector<16x128xf32>
    %124 = vector.extract_strided_slice %123 {offsets = [0, 0], sizes = [16, 32], strides = [1, 1]} : vector<16x128xf32> to vector<16x32xf32>
    %125 = vector.extract_strided_slice %2 {offsets = [5, 0], sizes = [1, 32], strides = [1, 1]} : vector<18x128xf32> to vector<1x32xf32>
    %126 = vector.broadcast %125 : vector<1x32xf32> to vector<16x32xf32>
    %127 = arith.addf %124, %126 : vector<16x32xf32>
    %128 = arith.addf %96, %127 : vector<16x32xf32>
    %129 = vector.extract_strided_slice %2 {offsets = [5, 64], sizes = [1, 32], strides = [1, 1]} : vector<18x128xf32> to vector<1x32xf32>
    %130 = vector.extract_strided_slice %2 {offsets = [5, 96], sizes = [1, 32], strides = [1, 1]} : vector<18x128xf32> to vector<1x32xf32>
    %cst_38 = arith.constant dense<0.000000e+00> : vector<16xf32>
    %131 = vector.multi_reduction <add>, %128, %cst_38 [1] : vector<16x32xf32> to vector<16xf32>
    %132 = vector.shape_cast %131 : vector<16xf32> to vector<16x1xf32>
    %cst_39 = arith.constant 3.200000e+01 : f32
    %133 = vector.broadcast %cst_39 : f32 to vector<16x1xf32>
    %134 = arith.divf %132, %133 : vector<16x1xf32>
    %135 = arith.mulf %128, %128 : vector<16x32xf32>
    %cst_40 = arith.constant dense<0.000000e+00> : vector<16xf32>
    %136 = vector.multi_reduction <add>, %135, %cst_40 [1] : vector<16x32xf32> to vector<16xf32>
    %137 = vector.shape_cast %136 : vector<16xf32> to vector<16x1xf32>
    %cst_41 = arith.constant 3.200000e+01 : f32
    %138 = vector.broadcast %cst_41 : f32 to vector<16x1xf32>
    %139 = arith.divf %137, %138 : vector<16x1xf32>
    %140 = arith.mulf %134, %134 : vector<16x1xf32>
    %141 = arith.subf %139, %140 : vector<16x1xf32>
    %142 = vector.broadcast %134 : vector<16x1xf32> to vector<16x32xf32>
    %143 = arith.subf %128, %142 : vector<16x32xf32>
    %cst_42 = arith.constant 9.99999974E-6 : f32
    %144 = vector.broadcast %cst_42 : f32 to vector<16x1xf32>
    %145 = arith.addf %141, %144 : vector<16x1xf32>
    %146 = math.rsqrt %145 : vector<16x1xf32>
    %147 = vector.broadcast %146 : vector<16x1xf32> to vector<16x32xf32>
    %148 = arith.mulf %143, %147 : vector<16x32xf32>
    %149 = vector.broadcast %129 : vector<1x32xf32> to vector<16x32xf32>
    %150 = arith.mulf %148, %149 : vector<16x32xf32>
    %151 = vector.broadcast %130 : vector<1x32xf32> to vector<16x32xf32>
    %152 = arith.addf %150, %151 : vector<16x32xf32>
    %153 = arith.truncf %152 : vector<16x32xf32> to vector<16x32xbf16>
    %cst_43 = arith.constant dense<0.000000e+00> : vector<16x128xf32>
    %154 = tpu.matmul %153, %99, %cst_43 {dimension_numbers = #tpu.dot_dimension_numbers<[1], [0], [0], [1], [0, 0, 1, 1], [], []>} : vector<16x32xbf16>, vector<32x128xbf16>, vector<16x128xf32> -> vector<16x128xf32>
    %155 = vector.extract_strided_slice %2 {offsets = [7, 0], sizes = [1, 128], strides = [1, 1]} : vector<18x128xf32> to vector<1x128xf32>
    %156 = vector.broadcast %155 : vector<1x128xf32> to vector<16x128xf32>
    %157 = arith.addf %154, %156 : vector<16x128xf32>
    %cst_44 = arith.constant 0.000000e+00 : f32
    %158 = vector.broadcast %cst_44 : f32 to vector<16x128xf32>
    %159 = arith.maximumf %157, %158 : vector<16x128xf32>
    %160 = arith.truncf %159 : vector<16x128xf32> to vector<16x128xbf16>
    %cst_45 = arith.constant dense<0.000000e+00> : vector<16x128xf32>
    %161 = tpu.matmul %160, %100, %cst_45 {dimension_numbers = #tpu.dot_dimension_numbers<[1], [0], [0], [1], [0, 0, 1, 1], [], []>} : vector<16x128xbf16>, vector<128x128xbf16>, vector<16x128xf32> -> vector<16x128xf32>
    %162 = vector.extract_strided_slice %161 {offsets = [0, 0], sizes = [16, 32], strides = [1, 1]} : vector<16x128xf32> to vector<16x32xf32>
    %163 = vector.extract_strided_slice %2 {offsets = [5, 32], sizes = [1, 32], strides = [1, 1]} : vector<18x128xf32> to vector<1x32xf32>
    %164 = vector.broadcast %163 : vector<1x32xf32> to vector<16x32xf32>
    %165 = arith.addf %162, %164 : vector<16x32xf32>
    %166 = arith.addf %152, %165 : vector<16x32xf32>
    %167 = vector.extract_strided_slice %2 {offsets = [6, 0], sizes = [1, 32], strides = [1, 1]} : vector<18x128xf32> to vector<1x32xf32>
    %168 = vector.extract_strided_slice %2 {offsets = [6, 32], sizes = [1, 32], strides = [1, 1]} : vector<18x128xf32> to vector<1x32xf32>
    %cst_46 = arith.constant dense<0.000000e+00> : vector<16xf32>
    %169 = vector.multi_reduction <add>, %166, %cst_46 [1] : vector<16x32xf32> to vector<16xf32>
    %170 = vector.shape_cast %169 : vector<16xf32> to vector<16x1xf32>
    %cst_47 = arith.constant 3.200000e+01 : f32
    %171 = vector.broadcast %cst_47 : f32 to vector<16x1xf32>
    %172 = arith.divf %170, %171 : vector<16x1xf32>
    %173 = arith.mulf %166, %166 : vector<16x32xf32>
    %cst_48 = arith.constant dense<0.000000e+00> : vector<16xf32>
    %174 = vector.multi_reduction <add>, %173, %cst_48 [1] : vector<16x32xf32> to vector<16xf32>
    %175 = vector.shape_cast %174 : vector<16xf32> to vector<16x1xf32>
    %cst_49 = arith.constant 3.200000e+01 : f32
    %176 = vector.broadcast %cst_49 : f32 to vector<16x1xf32>
    %177 = arith.divf %175, %176 : vector<16x1xf32>
    %178 = arith.mulf %172, %172 : vector<16x1xf32>
    %179 = arith.subf %177, %178 : vector<16x1xf32>
    %180 = vector.broadcast %172 : vector<16x1xf32> to vector<16x32xf32>
    %181 = arith.subf %166, %180 : vector<16x32xf32>
    %cst_50 = arith.constant 9.99999974E-6 : f32
    %182 = vector.broadcast %cst_50 : f32 to vector<16x1xf32>
    %183 = arith.addf %179, %182 : vector<16x1xf32>
    %184 = math.rsqrt %183 : vector<16x1xf32>
    %185 = vector.broadcast %184 : vector<16x1xf32> to vector<16x32xf32>
    %186 = arith.mulf %181, %185 : vector<16x32xf32>
    %187 = vector.broadcast %167 : vector<1x32xf32> to vector<16x32xf32>
    %188 = arith.mulf %186, %187 : vector<16x32xf32>
    %189 = vector.broadcast %168 : vector<1x32xf32> to vector<16x32xf32>
    %190 = arith.addf %188, %189 : vector<16x32xf32>
    %c448 = arith.constant 448 : index
    %c0_51 = arith.constant 0 : index
    %191 = vector.load %arg2[%c448, %c0_51] : memref<928x128xbf16, #tpu.memory_space<vmem>>, vector<32x128xbf16>
    %c480 = arith.constant 480 : index
    %c0_52 = arith.constant 0 : index
    %192 = vector.load %arg2[%c480, %c0_52] : memref<928x128xbf16, #tpu.memory_space<vmem>>, vector<32x128xbf16>
    %c512 = arith.constant 512 : index
    %c0_53 = arith.constant 0 : index
    %193 = vector.load %arg2[%c512, %c0_53] : memref<928x128xbf16, #tpu.memory_space<vmem>>, vector<32x128xbf16>
    %c544 = arith.constant 544 : index
    %c0_54 = arith.constant 0 : index
    %194 = vector.load %arg2[%c544, %c0_54] : memref<928x128xbf16, #tpu.memory_space<vmem>>, vector<128x128xbf16>
    %195 = arith.truncf %190 : vector<16x32xf32> to vector<16x32xbf16>
    %cst_55 = arith.constant dense<0.000000e+00> : vector<16x128xf32>
    %196 = tpu.matmul %195, %191, %cst_55 {dimension_numbers = #tpu.dot_dimension_numbers<[1], [0], [0], [1], [0, 0, 1, 1], [], []>} : vector<16x32xbf16>, vector<32x128xbf16>, vector<16x128xf32> -> vector<16x128xf32>
    %197 = vector.extract_strided_slice %2 {offsets = [8, 0], sizes = [1, 128], strides = [1, 1]} : vector<18x128xf32> to vector<1x128xf32>
    %198 = vector.broadcast %197 : vector<1x128xf32> to vector<16x128xf32>
    %199 = arith.addf %196, %198 : vector<16x128xf32>
    %200 = vector.extract_strided_slice %199 {offsets = [0, 0], sizes = [16, 32], strides = [1, 1]} : vector<16x128xf32> to vector<16x32xf32>
    %201 = vector.extract_strided_slice %199 {offsets = [0, 32], sizes = [16, 32], strides = [1, 1]} : vector<16x128xf32> to vector<16x32xf32>
    %202 = vector.extract_strided_slice %199 {offsets = [0, 64], sizes = [16, 32], strides = [1, 1]} : vector<16x128xf32> to vector<16x32xf32>
    %cst_56 = arith.constant dense<0.000000e+00> : vector<16x16xf32>
    %203 = tpu.matmul %200, %201, %cst_56 {dimension_numbers = #tpu.dot_dimension_numbers<[1], [1], [0], [0], [0, 0, 1, 0], [], []>} : vector<16x32xf32>, vector<16x32xf32>, vector<16x16xf32> -> vector<16x16xf32>
    %204 = arith.addf %203, %1 : vector<16x16xf32>
    %cst_57 = arith.constant dense<0xFF800000> : vector<16xf32>
    %205 = vector.multi_reduction <maximumf>, %204, %cst_57 [1] : vector<16x16xf32> to vector<16xf32>
    %206 = vector.shape_cast %205 : vector<16xf32> to vector<16x1xf32>
    %207 = vector.broadcast %206 : vector<16x1xf32> to vector<16x16xf32>
    %208 = arith.subf %204, %207 : vector<16x16xf32>
    %209 = math.exp %208 : vector<16x16xf32>
    %cst_58 = arith.constant dense<0.000000e+00> : vector<16xf32>
    %210 = vector.multi_reduction <add>, %209, %cst_58 [1] : vector<16x16xf32> to vector<16xf32>
    %211 = vector.shape_cast %210 : vector<16xf32> to vector<16x1xf32>
    %212 = tpu.reciprocal %211 {approx = true} : vector<16x1xf32> -> vector<16x1xf32>
    %213 = vector.broadcast %212 : vector<16x1xf32> to vector<16x16xf32>
    %214 = arith.mulf %209, %213 : vector<16x16xf32>
    %cst_59 = arith.constant dense<0.000000e+00> : vector<16x32xf32>
    %215 = tpu.matmul %214, %202, %cst_59 {dimension_numbers = #tpu.dot_dimension_numbers<[1], [0], [0], [1], [0, 0, 1, 1], [], []>} : vector<16x16xf32>, vector<16x32xf32>, vector<16x32xf32> -> vector<16x32xf32>
    %216 = arith.truncf %215 : vector<16x32xf32> to vector<16x32xbf16>
    %cst_60 = arith.constant dense<0.000000e+00> : vector<16x128xf32>
    %217 = tpu.matmul %216, %192, %cst_60 {dimension_numbers = #tpu.dot_dimension_numbers<[1], [0], [0], [1], [0, 0, 1, 1], [], []>} : vector<16x32xbf16>, vector<32x128xbf16>, vector<16x128xf32> -> vector<16x128xf32>
    %218 = vector.extract_strided_slice %217 {offsets = [0, 0], sizes = [16, 32], strides = [1, 1]} : vector<16x128xf32> to vector<16x32xf32>
    %219 = vector.extract_strided_slice %2 {offsets = [9, 0], sizes = [1, 32], strides = [1, 1]} : vector<18x128xf32> to vector<1x32xf32>
    %220 = vector.broadcast %219 : vector<1x32xf32> to vector<16x32xf32>
    %221 = arith.addf %218, %220 : vector<16x32xf32>
    %222 = arith.addf %190, %221 : vector<16x32xf32>
    %223 = vector.extract_strided_slice %2 {offsets = [9, 64], sizes = [1, 32], strides = [1, 1]} : vector<18x128xf32> to vector<1x32xf32>
    %224 = vector.extract_strided_slice %2 {offsets = [9, 96], sizes = [1, 32], strides = [1, 1]} : vector<18x128xf32> to vector<1x32xf32>
    %cst_61 = arith.constant dense<0.000000e+00> : vector<16xf32>
    %225 = vector.multi_reduction <add>, %222, %cst_61 [1] : vector<16x32xf32> to vector<16xf32>
    %226 = vector.shape_cast %225 : vector<16xf32> to vector<16x1xf32>
    %cst_62 = arith.constant 3.200000e+01 : f32
    %227 = vector.broadcast %cst_62 : f32 to vector<16x1xf32>
    %228 = arith.divf %226, %227 : vector<16x1xf32>
    %229 = arith.mulf %222, %222 : vector<16x32xf32>
    %cst_63 = arith.constant dense<0.000000e+00> : vector<16xf32>
    %230 = vector.multi_reduction <add>, %229, %cst_63 [1] : vector<16x32xf32> to vector<16xf32>
    %231 = vector.shape_cast %230 : vector<16xf32> to vector<16x1xf32>
    %cst_64 = arith.constant 3.200000e+01 : f32
    %232 = vector.broadcast %cst_64 : f32 to vector<16x1xf32>
    %233 = arith.divf %231, %232 : vector<16x1xf32>
    %234 = arith.mulf %228, %228 : vector<16x1xf32>
    %235 = arith.subf %233, %234 : vector<16x1xf32>
    %236 = vector.broadcast %228 : vector<16x1xf32> to vector<16x32xf32>
    %237 = arith.subf %222, %236 : vector<16x32xf32>
    %cst_65 = arith.constant 9.99999974E-6 : f32
    %238 = vector.broadcast %cst_65 : f32 to vector<16x1xf32>
    %239 = arith.addf %235, %238 : vector<16x1xf32>
    %240 = math.rsqrt %239 : vector<16x1xf32>
    %241 = vector.broadcast %240 : vector<16x1xf32> to vector<16x32xf32>
    %242 = arith.mulf %237, %241 : vector<16x32xf32>
    %243 = vector.broadcast %223 : vector<1x32xf32> to vector<16x32xf32>
    %244 = arith.mulf %242, %243 : vector<16x32xf32>
    %245 = vector.broadcast %224 : vector<1x32xf32> to vector<16x32xf32>
    %246 = arith.addf %244, %245 : vector<16x32xf32>
    %247 = arith.truncf %246 : vector<16x32xf32> to vector<16x32xbf16>
    %cst_66 = arith.constant dense<0.000000e+00> : vector<16x128xf32>
    %248 = tpu.matmul %247, %193, %cst_66 {dimension_numbers = #tpu.dot_dimension_numbers<[1], [0], [0], [1], [0, 0, 1, 1], [], []>} : vector<16x32xbf16>, vector<32x128xbf16>, vector<16x128xf32> -> vector<16x128xf32>
    %249 = vector.extract_strided_slice %2 {offsets = [11, 0], sizes = [1, 128], strides = [1, 1]} : vector<18x128xf32> to vector<1x128xf32>
    %250 = vector.broadcast %249 : vector<1x128xf32> to vector<16x128xf32>
    %251 = arith.addf %248, %250 : vector<16x128xf32>
    %cst_67 = arith.constant 0.000000e+00 : f32
    %252 = vector.broadcast %cst_67 : f32 to vector<16x128xf32>
    %253 = arith.maximumf %251, %252 : vector<16x128xf32>
    %254 = arith.truncf %253 : vector<16x128xf32> to vector<16x128xbf16>
    %cst_68 = arith.constant dense<0.000000e+00> : vector<16x128xf32>
    %255 = tpu.matmul %254, %194, %cst_68 {dimension_numbers = #tpu.dot_dimension_numbers<[1], [0], [0], [1], [0, 0, 1, 1], [], []>} : vector<16x128xbf16>, vector<128x128xbf16>, vector<16x128xf32> -> vector<16x128xf32>
    %256 = vector.extract_strided_slice %255 {offsets = [0, 0], sizes = [16, 32], strides = [1, 1]} : vector<16x128xf32> to vector<16x32xf32>
    %257 = vector.extract_strided_slice %2 {offsets = [9, 32], sizes = [1, 32], strides = [1, 1]} : vector<18x128xf32> to vector<1x32xf32>
    %258 = vector.broadcast %257 : vector<1x32xf32> to vector<16x32xf32>
    %259 = arith.addf %256, %258 : vector<16x32xf32>
    %260 = arith.addf %246, %259 : vector<16x32xf32>
    %261 = vector.extract_strided_slice %2 {offsets = [10, 0], sizes = [1, 32], strides = [1, 1]} : vector<18x128xf32> to vector<1x32xf32>
    %262 = vector.extract_strided_slice %2 {offsets = [10, 32], sizes = [1, 32], strides = [1, 1]} : vector<18x128xf32> to vector<1x32xf32>
    %cst_69 = arith.constant dense<0.000000e+00> : vector<16xf32>
    %263 = vector.multi_reduction <add>, %260, %cst_69 [1] : vector<16x32xf32> to vector<16xf32>
    %264 = vector.shape_cast %263 : vector<16xf32> to vector<16x1xf32>
    %cst_70 = arith.constant 3.200000e+01 : f32
    %265 = vector.broadcast %cst_70 : f32 to vector<16x1xf32>
    %266 = arith.divf %264, %265 : vector<16x1xf32>
    %267 = arith.mulf %260, %260 : vector<16x32xf32>
    %cst_71 = arith.constant dense<0.000000e+00> : vector<16xf32>
    %268 = vector.multi_reduction <add>, %267, %cst_71 [1] : vector<16x32xf32> to vector<16xf32>
    %269 = vector.shape_cast %268 : vector<16xf32> to vector<16x1xf32>
    %cst_72 = arith.constant 3.200000e+01 : f32
    %270 = vector.broadcast %cst_72 : f32 to vector<16x1xf32>
    %271 = arith.divf %269, %270 : vector<16x1xf32>
    %272 = arith.mulf %266, %266 : vector<16x1xf32>
    %273 = arith.subf %271, %272 : vector<16x1xf32>
    %274 = vector.broadcast %266 : vector<16x1xf32> to vector<16x32xf32>
    %275 = arith.subf %260, %274 : vector<16x32xf32>
    %cst_73 = arith.constant 9.99999974E-6 : f32
    %276 = vector.broadcast %cst_73 : f32 to vector<16x1xf32>
    %277 = arith.addf %273, %276 : vector<16x1xf32>
    %278 = math.rsqrt %277 : vector<16x1xf32>
    %279 = vector.broadcast %278 : vector<16x1xf32> to vector<16x32xf32>
    %280 = arith.mulf %275, %279 : vector<16x32xf32>
    %281 = vector.broadcast %261 : vector<1x32xf32> to vector<16x32xf32>
    %282 = arith.mulf %280, %281 : vector<16x32xf32>
    %283 = vector.broadcast %262 : vector<1x32xf32> to vector<16x32xf32>
    %284 = arith.addf %282, %283 : vector<16x32xf32>
    %c672 = arith.constant 672 : index
    %c0_74 = arith.constant 0 : index
    %285 = vector.load %arg2[%c672, %c0_74] : memref<928x128xbf16, #tpu.memory_space<vmem>>, vector<32x128xbf16>
    %c704 = arith.constant 704 : index
    %c0_75 = arith.constant 0 : index
    %286 = vector.load %arg2[%c704, %c0_75] : memref<928x128xbf16, #tpu.memory_space<vmem>>, vector<32x128xbf16>
    %c736 = arith.constant 736 : index
    %c0_76 = arith.constant 0 : index
    %287 = vector.load %arg2[%c736, %c0_76] : memref<928x128xbf16, #tpu.memory_space<vmem>>, vector<32x128xbf16>
    %c768 = arith.constant 768 : index
    %c0_77 = arith.constant 0 : index
    %288 = vector.load %arg2[%c768, %c0_77] : memref<928x128xbf16, #tpu.memory_space<vmem>>, vector<128x128xbf16>
    %289 = arith.truncf %284 : vector<16x32xf32> to vector<16x32xbf16>
    %cst_78 = arith.constant dense<0.000000e+00> : vector<16x128xf32>
    %290 = tpu.matmul %289, %285, %cst_78 {dimension_numbers = #tpu.dot_dimension_numbers<[1], [0], [0], [1], [0, 0, 1, 1], [], []>} : vector<16x32xbf16>, vector<32x128xbf16>, vector<16x128xf32> -> vector<16x128xf32>
    %291 = vector.extract_strided_slice %2 {offsets = [12, 0], sizes = [1, 128], strides = [1, 1]} : vector<18x128xf32> to vector<1x128xf32>
    %292 = vector.broadcast %291 : vector<1x128xf32> to vector<16x128xf32>
    %293 = arith.addf %290, %292 : vector<16x128xf32>
    %294 = vector.extract_strided_slice %293 {offsets = [0, 0], sizes = [16, 32], strides = [1, 1]} : vector<16x128xf32> to vector<16x32xf32>
    %295 = vector.extract_strided_slice %293 {offsets = [0, 32], sizes = [16, 32], strides = [1, 1]} : vector<16x128xf32> to vector<16x32xf32>
    %296 = vector.extract_strided_slice %293 {offsets = [0, 64], sizes = [16, 32], strides = [1, 1]} : vector<16x128xf32> to vector<16x32xf32>
    %cst_79 = arith.constant dense<0.000000e+00> : vector<16x16xf32>
    %297 = tpu.matmul %294, %295, %cst_79 {dimension_numbers = #tpu.dot_dimension_numbers<[1], [1], [0], [0], [0, 0, 1, 0], [], []>} : vector<16x32xf32>, vector<16x32xf32>, vector<16x16xf32> -> vector<16x16xf32>
    %298 = arith.addf %297, %1 : vector<16x16xf32>
    %cst_80 = arith.constant dense<0xFF800000> : vector<16xf32>
    %299 = vector.multi_reduction <maximumf>, %298, %cst_80 [1] : vector<16x16xf32> to vector<16xf32>
    %300 = vector.shape_cast %299 : vector<16xf32> to vector<16x1xf32>
    %301 = vector.broadcast %300 : vector<16x1xf32> to vector<16x16xf32>
    %302 = arith.subf %298, %301 : vector<16x16xf32>
    %303 = math.exp %302 : vector<16x16xf32>
    %cst_81 = arith.constant dense<0.000000e+00> : vector<16xf32>
    %304 = vector.multi_reduction <add>, %303, %cst_81 [1] : vector<16x16xf32> to vector<16xf32>
    %305 = vector.shape_cast %304 : vector<16xf32> to vector<16x1xf32>
    %306 = tpu.reciprocal %305 {approx = true} : vector<16x1xf32> -> vector<16x1xf32>
    %307 = vector.broadcast %306 : vector<16x1xf32> to vector<16x16xf32>
    %308 = arith.mulf %303, %307 : vector<16x16xf32>
    %cst_82 = arith.constant dense<0.000000e+00> : vector<16x32xf32>
    %309 = tpu.matmul %308, %296, %cst_82 {dimension_numbers = #tpu.dot_dimension_numbers<[1], [0], [0], [1], [0, 0, 1, 1], [], []>} : vector<16x16xf32>, vector<16x32xf32>, vector<16x32xf32> -> vector<16x32xf32>
    %310 = arith.truncf %309 : vector<16x32xf32> to vector<16x32xbf16>
    %cst_83 = arith.constant dense<0.000000e+00> : vector<16x128xf32>
    %311 = tpu.matmul %310, %286, %cst_83 {dimension_numbers = #tpu.dot_dimension_numbers<[1], [0], [0], [1], [0, 0, 1, 1], [], []>} : vector<16x32xbf16>, vector<32x128xbf16>, vector<16x128xf32> -> vector<16x128xf32>
    %312 = vector.extract_strided_slice %311 {offsets = [0, 0], sizes = [16, 32], strides = [1, 1]} : vector<16x128xf32> to vector<16x32xf32>
    %313 = vector.extract_strided_slice %2 {offsets = [13, 0], sizes = [1, 32], strides = [1, 1]} : vector<18x128xf32> to vector<1x32xf32>
    %314 = vector.broadcast %313 : vector<1x32xf32> to vector<16x32xf32>
    %315 = arith.addf %312, %314 : vector<16x32xf32>
    %316 = arith.addf %284, %315 : vector<16x32xf32>
    %317 = vector.extract_strided_slice %2 {offsets = [13, 64], sizes = [1, 32], strides = [1, 1]} : vector<18x128xf32> to vector<1x32xf32>
    %318 = vector.extract_strided_slice %2 {offsets = [13, 96], sizes = [1, 32], strides = [1, 1]} : vector<18x128xf32> to vector<1x32xf32>
    %cst_84 = arith.constant dense<0.000000e+00> : vector<16xf32>
    %319 = vector.multi_reduction <add>, %316, %cst_84 [1] : vector<16x32xf32> to vector<16xf32>
    %320 = vector.shape_cast %319 : vector<16xf32> to vector<16x1xf32>
    %cst_85 = arith.constant 3.200000e+01 : f32
    %321 = vector.broadcast %cst_85 : f32 to vector<16x1xf32>
    %322 = arith.divf %320, %321 : vector<16x1xf32>
    %323 = arith.mulf %316, %316 : vector<16x32xf32>
    %cst_86 = arith.constant dense<0.000000e+00> : vector<16xf32>
    %324 = vector.multi_reduction <add>, %323, %cst_86 [1] : vector<16x32xf32> to vector<16xf32>
    %325 = vector.shape_cast %324 : vector<16xf32> to vector<16x1xf32>
    %cst_87 = arith.constant 3.200000e+01 : f32
    %326 = vector.broadcast %cst_87 : f32 to vector<16x1xf32>
    %327 = arith.divf %325, %326 : vector<16x1xf32>
    %328 = arith.mulf %322, %322 : vector<16x1xf32>
    %329 = arith.subf %327, %328 : vector<16x1xf32>
    %330 = vector.broadcast %322 : vector<16x1xf32> to vector<16x32xf32>
    %331 = arith.subf %316, %330 : vector<16x32xf32>
    %cst_88 = arith.constant 9.99999974E-6 : f32
    %332 = vector.broadcast %cst_88 : f32 to vector<16x1xf32>
    %333 = arith.addf %329, %332 : vector<16x1xf32>
    %334 = math.rsqrt %333 : vector<16x1xf32>
    %335 = vector.broadcast %334 : vector<16x1xf32> to vector<16x32xf32>
    %336 = arith.mulf %331, %335 : vector<16x32xf32>
    %337 = vector.broadcast %317 : vector<1x32xf32> to vector<16x32xf32>
    %338 = arith.mulf %336, %337 : vector<16x32xf32>
    %339 = vector.broadcast %318 : vector<1x32xf32> to vector<16x32xf32>
    %340 = arith.addf %338, %339 : vector<16x32xf32>
    %341 = arith.truncf %340 : vector<16x32xf32> to vector<16x32xbf16>
    %cst_89 = arith.constant dense<0.000000e+00> : vector<16x128xf32>
    %342 = tpu.matmul %341, %287, %cst_89 {dimension_numbers = #tpu.dot_dimension_numbers<[1], [0], [0], [1], [0, 0, 1, 1], [], []>} : vector<16x32xbf16>, vector<32x128xbf16>, vector<16x128xf32> -> vector<16x128xf32>
    %343 = vector.extract_strided_slice %2 {offsets = [15, 0], sizes = [1, 128], strides = [1, 1]} : vector<18x128xf32> to vector<1x128xf32>
    %344 = vector.broadcast %343 : vector<1x128xf32> to vector<16x128xf32>
    %345 = arith.addf %342, %344 : vector<16x128xf32>
    %cst_90 = arith.constant 0.000000e+00 : f32
    %346 = vector.broadcast %cst_90 : f32 to vector<16x128xf32>
    %347 = arith.maximumf %345, %346 : vector<16x128xf32>
    %348 = arith.truncf %347 : vector<16x128xf32> to vector<16x128xbf16>
    %cst_91 = arith.constant dense<0.000000e+00> : vector<16x128xf32>
    %349 = tpu.matmul %348, %288, %cst_91 {dimension_numbers = #tpu.dot_dimension_numbers<[1], [0], [0], [1], [0, 0, 1, 1], [], []>} : vector<16x128xbf16>, vector<128x128xbf16>, vector<16x128xf32> -> vector<16x128xf32>
    %350 = vector.extract_strided_slice %349 {offsets = [0, 0], sizes = [16, 32], strides = [1, 1]} : vector<16x128xf32> to vector<16x32xf32>
    %351 = vector.extract_strided_slice %2 {offsets = [13, 32], sizes = [1, 32], strides = [1, 1]} : vector<18x128xf32> to vector<1x32xf32>
    %352 = vector.broadcast %351 : vector<1x32xf32> to vector<16x32xf32>
    %353 = arith.addf %350, %352 : vector<16x32xf32>
    %354 = arith.addf %340, %353 : vector<16x32xf32>
    %355 = vector.extract_strided_slice %2 {offsets = [14, 0], sizes = [1, 32], strides = [1, 1]} : vector<18x128xf32> to vector<1x32xf32>
    %356 = vector.extract_strided_slice %2 {offsets = [14, 32], sizes = [1, 32], strides = [1, 1]} : vector<18x128xf32> to vector<1x32xf32>
    %cst_92 = arith.constant dense<0.000000e+00> : vector<16xf32>
    %357 = vector.multi_reduction <add>, %354, %cst_92 [1] : vector<16x32xf32> to vector<16xf32>
    %358 = vector.shape_cast %357 : vector<16xf32> to vector<16x1xf32>
    %cst_93 = arith.constant 3.200000e+01 : f32
    %359 = vector.broadcast %cst_93 : f32 to vector<16x1xf32>
    %360 = arith.divf %358, %359 : vector<16x1xf32>
    %361 = arith.mulf %354, %354 : vector<16x32xf32>
    %cst_94 = arith.constant dense<0.000000e+00> : vector<16xf32>
    %362 = vector.multi_reduction <add>, %361, %cst_94 [1] : vector<16x32xf32> to vector<16xf32>
    %363 = vector.shape_cast %362 : vector<16xf32> to vector<16x1xf32>
    %cst_95 = arith.constant 3.200000e+01 : f32
    %364 = vector.broadcast %cst_95 : f32 to vector<16x1xf32>
    %365 = arith.divf %363, %364 : vector<16x1xf32>
    %366 = arith.mulf %360, %360 : vector<16x1xf32>
    %367 = arith.subf %365, %366 : vector<16x1xf32>
    %368 = vector.broadcast %360 : vector<16x1xf32> to vector<16x32xf32>
    %369 = arith.subf %354, %368 : vector<16x32xf32>
    %cst_96 = arith.constant 9.99999974E-6 : f32
    %370 = vector.broadcast %cst_96 : f32 to vector<16x1xf32>
    %371 = arith.addf %367, %370 : vector<16x1xf32>
    %372 = math.rsqrt %371 : vector<16x1xf32>
    %373 = vector.broadcast %372 : vector<16x1xf32> to vector<16x32xf32>
    %374 = arith.mulf %369, %373 : vector<16x32xf32>
    %375 = vector.broadcast %355 : vector<1x32xf32> to vector<16x32xf32>
    %376 = arith.mulf %374, %375 : vector<16x32xf32>
    %377 = vector.broadcast %356 : vector<1x32xf32> to vector<16x32xf32>
    %378 = arith.addf %376, %377 : vector<16x32xf32>
    %379 = vector.extract_strided_slice %2 {offsets = [16, 0], sizes = [1, 32], strides = [1, 1]} : vector<18x128xf32> to vector<1x32xf32>
    %380 = vector.extract_strided_slice %2 {offsets = [16, 32], sizes = [1, 32], strides = [1, 1]} : vector<18x128xf32> to vector<1x32xf32>
    %cst_97 = arith.constant dense<0.000000e+00> : vector<16xf32>
    %381 = vector.multi_reduction <add>, %378, %cst_97 [1] : vector<16x32xf32> to vector<16xf32>
    %382 = vector.shape_cast %381 : vector<16xf32> to vector<16x1xf32>
    %cst_98 = arith.constant 3.200000e+01 : f32
    %383 = vector.broadcast %cst_98 : f32 to vector<16x1xf32>
    %384 = arith.divf %382, %383 : vector<16x1xf32>
    %385 = arith.mulf %378, %378 : vector<16x32xf32>
    %cst_99 = arith.constant dense<0.000000e+00> : vector<16xf32>
    %386 = vector.multi_reduction <add>, %385, %cst_99 [1] : vector<16x32xf32> to vector<16xf32>
    %387 = vector.shape_cast %386 : vector<16xf32> to vector<16x1xf32>
    %cst_100 = arith.constant 3.200000e+01 : f32
    %388 = vector.broadcast %cst_100 : f32 to vector<16x1xf32>
    %389 = arith.divf %387, %388 : vector<16x1xf32>
    %390 = arith.mulf %384, %384 : vector<16x1xf32>
    %391 = arith.subf %389, %390 : vector<16x1xf32>
    %392 = vector.broadcast %384 : vector<16x1xf32> to vector<16x32xf32>
    %393 = arith.subf %378, %392 : vector<16x32xf32>
    %cst_101 = arith.constant 9.99999974E-6 : f32
    %394 = vector.broadcast %cst_101 : f32 to vector<16x1xf32>
    %395 = arith.addf %391, %394 : vector<16x1xf32>
    %396 = math.rsqrt %395 : vector<16x1xf32>
    %397 = vector.broadcast %396 : vector<16x1xf32> to vector<16x32xf32>
    %398 = arith.mulf %393, %397 : vector<16x32xf32>
    %399 = vector.broadcast %379 : vector<1x32xf32> to vector<16x32xf32>
    %400 = arith.mulf %398, %399 : vector<16x32xf32>
    %401 = vector.broadcast %380 : vector<1x32xf32> to vector<16x32xf32>
    %402 = arith.addf %400, %401 : vector<16x32xf32>
    %c896 = arith.constant 896 : index
    %c0_102 = arith.constant 0 : index
    %403 = vector.load %arg2[%c896, %c0_102] : memref<928x128xbf16, #tpu.memory_space<vmem>>, vector<32x128xbf16>
    %404 = arith.truncf %402 : vector<16x32xf32> to vector<16x32xbf16>
    %cst_103 = arith.constant dense<0.000000e+00> : vector<16x128xf32>
    %405 = tpu.matmul %404, %403, %cst_103 {dimension_numbers = #tpu.dot_dimension_numbers<[1], [0], [0], [1], [0, 0, 1, 1], [], []>} : vector<16x32xbf16>, vector<32x128xbf16>, vector<16x128xf32> -> vector<16x128xf32>
    %406 = vector.extract_strided_slice %2 {offsets = [17, 0], sizes = [1, 128], strides = [1, 1]} : vector<18x128xf32> to vector<1x128xf32>
    %407 = vector.broadcast %406 : vector<1x128xf32> to vector<16x128xf32>
    %408 = arith.addf %405, %407 : vector<16x128xf32>
    %c0_104 = arith.constant 0 : index
    %c0_105 = arith.constant 0 : index
    %409 = vector.load %arg4[%c0_104, %c0_105] : memref<16x128xf32, #tpu.memory_space<vmem>>, vector<16x128xf32>
    tpu.vector_store %arg4[%c0_104, %c0_105], %408 {strides = array<i32>} : memref<16x128xf32, #tpu.memory_space<vmem>>, vector<16x128xf32>,
    return
  }
}

</mosaic_0001>

<bundles_post_ra>
// kernel: forward_transformer.1
= control target key start
LH: loop header
LB: loop body
LE: loop exit
PB: predicated region body
PF: predicated region fallthrough
CT: control target
= control target key end

     0   :  { %9 = vsyncpa [#allocation3], 0  ;;  %s3680_s0 = inlined_call_operand.vmem [shape: f32[16,32], index: 0, kind: input, shape index: {}]   ;;  %s3681_s1 = inlined_call_operand.vmem [shape: f32[16,16], index: 1, kind: input, shape index: {}]   ;;  %s3682_s2 = inlined_call_operand.hbm [shape: bf16[928,128], index: 2, kind: input, shape index: {}]   ;;  %s3683_s3 = inlined_call_operand.vmem [shape: f32[18,128], index: 3, kind: input, shape index: {}]   ;;  %s3684_s4 = inlined_call_operand.hbm [shape: f32[16,128], index: 4, kind: output, shape index: {}]  }
   0x1   :  { %10 = vsyncpa [#allocation4], 0  ;;  %s3257_s15 = smov [#allocation2]   ;;  %s3209_s19 = scalar_lea.hbm %s3682_s2, 7424 }
   0x2   :  { %s20_s16 = sshll.u32 %s3257_s15, 4  ;;  %p3210_p0 = scmp.ne.s32.totalorder %s3682_s2, %s3209_s19  ;;  %s21_s16 = int_to_ptr.vmem [resolvable:$true] %s20_s16 }
   0x3   :  { %p3213_p1 = scmp.lt.u32.totalorder %s3209_s19, %s3682_s2 }
   0x5   :  { %p3215_p2 = pnand %p3213_p1, %p3210_p0 }
   0x7   :  { %3218 = shalt.err (!%p3215_p2)
}
   0x8   :  { %s3219_s24 = scalar_lea.vmem %s21_s16, 7424  ;;  %p3224_p4 = scmp.lt.s32.totalorder %s21_s16, %s21_s16 }
   0x9   :  { %p3220_p3 = scmp.ne.s32.totalorder %s21_s16, %s3219_s24  ;;  %p3225_p5 = scmp.lt.s32.totalorder %s3219_s24, %s3219_s24 }
   0xb   :  { %p3226_p6 = por %p3225_p5, %p3224_p4 }
   0xd   :  { %p3227_p7 = pnand %p3226_p6, %p3220_p3 }
   0xf   :  { %3230 = shalt.err (!%p3227_p7)
}
  0x10   :  { %s3258_s25 = smov 64   ;;  %s3259_s26 = smov 4  }
  0x11   :  { %26 = dma.hbm_to_vmem [thread:$0]  %s3682_s2, 7424, %s21_s16, [#allocation3], %s3258_s25, %s3258_s25, %s3259_s26  }
  0x12   :  { %3253 = dma.done.wait [#allocation3], 7424  }
  0x13   :  { %3254 = vsyncadd [#allocation3], 4294959872  ;;  %v3260_v0 = vmov 0.0   ;;  %vm3261_vm0 = vmmov 0   ;;  %v3081_v1 = vld [vmem:[#allocation2] sm:$0xff]   ;;  %v3082_v2 = vld [vmem:[#allocation2 + $0x8] sm:$0xff]   ;;  %v69_v6 = vlaneseq }
  0x14   :  { %2751 = vmatprep.subr.bf16.mxu0 %v3260_v0  ;;  %2755 = vmatprep.mubr.msk.bf16.mxu0 %vm3261_vm0, %v3260_v0  ;;  %v3312_v3 = vld [vmem:[%s3680_s0] sm:$0xff]  ;;  %v3317_v4 = vld [vmem:[%s3680_s0 + $0x8] sm:$0xff]  ;;  %vm85_vm1 = vcmask 261120   ;;  %s3262_s0 = smov 96   ;;  %vm219_vm3 = vcmask 130048   ;;  %v3083_v41 = vld [vmem:[#allocation2 + $0x10] sm:$0xff]  }
  0x15   :  { %2752 = vmatpush3.bf16.msra.mxu0 %v3081_v1  ;;  %v68_v5 = vpack.c.bf16 %v3317_v4, %v3312_v3  ;;  %v3323_v7 = vshrl.u32 %v69_v6, 7  ;;  %v3331_v9 = vld [vmem:[%s3683_s3] sm:$0xff]  ;;  %vm3339_vm2 = vmpackc.low %vm85_vm1, %vm85_vm1  ;;  %v3354_v23 = vld [vmem:[%s3681_s1 + $0x8] sm:$0xff]  ;;  %s3263_s12 = smov 32  }
  0x16   :  { %2753 = vmatprep.subr.bf16.mxu0 %v3260_v0  ;;  %v3359_v24 = vld [vmem:[%s3681_s1] sm:$0xff]  ;;  %v3084_v52 = vld [vmem:[#allocation2 + $0x18] sm:$0xff]  }
  0x17   :  { %v3326_v8 = vsub.s32 0, %v3323_v7  ;;  %v3379_v56 = vsub.s32 1, %v3323_v7 }
  0x19   :  { %2754 = vmatpush3.bf16.msra.mxu0 %v3082_v2  ;;  %v72_v10 = vrot.slane %v3331_v9, %v3326_v8  ;;  %v389_v57 = vrot.slane %v3331_v9, %v3379_v56 }
  0x1c   :  { %2756 = vmatmul.mubr.msk.bf16.vlgmr.msra.gmra.mrb[0].mxu0 %vm85_vm1, %v68_v5 }
  0xef   :  { %v123_v11 = vpop.f32.mrb[0].mxu0 }
  0xf0   :  { %v124_v12 = vadd.f32 %v123_v11, %v72_v10  ;;  %v2757_v13 = vpop.f32.mrb[1].mxu0 }
  0xf1   :  { %v126_v14 = vpop.f32.mrb[2].mxu0 }
  0xf2   :  { %v127_v15 = vadd.f32 %v126_v14, %v72_v10  ;;  %v2758_v16 = vpop.f32.mrb[3].mxu0  ;;  %2763 = vmatprep.mubr.msk.f32.mxu0 %vm85_vm1, %v124_v12  ;;  %v3087_v14 = vld [vmem:[#allocation2 + $0x30] sm:$0xff]  }
  0xf3   :  { %v3089_v16 = vld [vmem:[#allocation2 + $0x40] sm:$0xff]  }
  0xf4   :  { %v3041_v17 = vpack.i.bf16 %v127_v15, %v124_v12 }
  0xf6   :  { %3042 = vrot.lane.b32.xlu0 %v3041_v17, %s3262_s0 }
 0x168   :  { %v3043_v18 = vpop.permute.xlu0 %3042 }
 0x169   :  { %v3045_v19 = vunpack.i.h.bf16 %v3043_v18  ;;  %v3044_v20 = vunpack.i.l.bf16 %v3043_v18  ;;  %v3091_v18 = vld [vmem:[#allocation2 + $0x50] sm:$0xff]  }
 0x16b   :  { %v2991_v22 = vpack.c.bf16 %v3045_v19, %v3044_v20  ;;  %v3092_v19 = vld [vmem:[#allocation2 + $0x58] sm:$0xff]  }
 0x16d   :  { %2993 = vmatprep.subr.msk.bf16.mxu0 %vm3339_vm2, %v2991_v22 }
 0x16e   :  { %2996 = vmatpush3.bf16.xpose.msk.msra.mxu0 %vm3339_vm2, %v2991_v22 }
 0x16f   :  { %2773 = vmatprep.subr.bf16.mxu0 %v3260_v0 }
 0x175   :  { %2764 = vmatmul.mubr.msk.f32.vlgmr.msra.gmra.mrb[4].mxu0 %vm85_vm1, %v127_v15  ;;  %v3088_v15 = vld [vmem:[#allocation2 + $0x38] sm:$0xff]  }
 0x176   :  { %2777 = vmatprep.mubr.msk.bf16.mxu0 %vm3261_vm0, %v3260_v0  ;;  %2774 = vmatpush3.bf16.msra.mxu0 %v3083_v41 }
 0x177   :  { %2775 = vmatprep.subr.bf16.mxu0 %v3260_v0 }
 0x17a   :  { %2776 = vmatpush3.bf16.msra.mxu0 %v3084_v52  ;;  %v439_v52 = vsub.s32 3, %v3323_v7 }
 0x17b   :  { %2789 = vmatprep.subr.bf16.mxu0 %v3260_v0 }
 0x248   :  { %v2765_v25 = vpop.f32.mrb[4].mxu0 }
 0x249   :  { %v216_v26 = vadd.f32 %v2765_v25, %v3354_v23  ;;  %v210_v27 = vpop.f32.mrb[5].mxu0 }
 0x24a   :  { %v211_v28 = vadd.f32 %v210_v27, %v3359_v24 }
 0x24b   :  { %v223_v29 = vsel %vm219_vm3, %v216_v26, -inf }
 0x24c   :  { %224 = vmax.xlane.f32.xlu1 %v223_v29  ;;  %v220_v30 = vsel %vm219_vm3, %v211_v28, -inf }
 0x24d   :  { %221 = vmax.xlane.f32.xlu0 %v220_v30 }
 0x2d9   :  { %v225_v31 = vpop.xlane.xlu1 %224 }
 0x2da   :  { %v227_v32 = vsub.f32 %v216_v26, %v225_v31  ;;  %v222_v33 = vpop.xlane.xlu0 %221 }
 0x2db   :  { %v226_v34 = vsub.f32 %v211_v28, %v222_v33 }
 0x2dc   :  { %v230_v35 = vmul.f32 1.442695, %v227_v32 }
 0x2dd   :  { %v228_v36 = vmul.f32 1.442695, %v226_v34 }
 0x2de   :  { %3139 = vpow2.f32 %v230_v35 }
 0x2df   :  { %3141 = vpow2.f32 %v228_v36 }
 0x2e8   :  { %v3140_v37 = vpop.eup %3139 }
 0x2e9   :  { %v235_v38 = vsel %vm219_vm3, %v3140_v37, 0.0  ;;  %v3142_v39 = vpop.eup %3141 }
 0x2ea   :  { %236 = vadd.xlane.f32.xlu1 %v235_v38  ;;  %v232_v40 = vsel %vm219_vm3, %v3142_v39, 0.0 }
 0x2ee   :  { %233 = vadd.xlane.f32.xlu1 %v232_v40 }
 0x2ff   :  { %3047 = vrot.lane.b32.xlu1 %v3041_v17, %s3258_s25  ;;  %v3090_v17 = vld [vmem:[#allocation2 + $0x48] sm:$0xff]  }
 0x377   :  { %v237_v42 = vpop.xlane.xlu1 %236 }
 0x378   :  { %3143 = vrcp.f32 %v237_v42 }
 0x37b   :  { %v234_v43 = vpop.xlane.xlu1 %233 }
 0x37c   :  { %3145 = vrcp.f32 %v234_v43 }
 0x37f   :  { %v3048_v44 = vpop.permute.xlu1 %3047 }
 0x380   :  { %v3050_v45 = vunpack.i.h.bf16 %v3048_v44  ;;  %v3049_v46 = vunpack.i.l.bf16 %v3048_v44 }
 0x382   :  { %v2997_v47 = vpack.c.bf16 %v3050_v45, %v3049_v46  ;;  %v3144_v48 = vpop.eup %3143 }
 0x383   :  { %v241_v51 = vmul.f32 %v3144_v48, %v3140_v37 }
 0x384   :  { %2998 = vmatprep.subr.bf16.mxu1 %v2997_v47 }
 0x385   :  { %3000 = vmatpush3.bf16.msra.mxu1 %v2997_v47 }
 0x386   :  { %v3146_v49 = vpop.eup %3145  ;;  %2781 = vmatprep.subr.bf16.mxu1 %v3260_v0 }
 0x387   :  { %v240_v50 = vmul.f32 %v3146_v49, %v3142_v39 }
 0x389   :  { %2770 = vmatprep.mubr.msk.f32.mxu1 %vm219_vm3, %v240_v50  ;;  %v3093_v50 = vld [vmem:[#allocation2 + $0x60] sm:$0xff]  }
 0x38a   :  { %2771 = vmatmul.mubr.msk.f32.vlgmr.msra.gmra.mrb[0].mxu1 %vm219_vm3, %v241_v51  ;;  %v3094_v51 = vld [vmem:[#allocation2 + $0x68] sm:$0xff]  }
 0x38b   :  { %2785 = vmatprep.mubr.msk.bf16.mxu1 %vm3261_vm0, %v3260_v0 }
 0x45d   :  { %v2772_v53 = vpop.f32.mrb[0].mxu1 }
 0x45e   :  { %v320_v54 = vpop.f32.mrb[1].mxu1 }
 0x45f   :  { %v329_v55 = vpack.c.bf16 %v2772_v53, %v320_v54  ;;  %v440_v53 = vrot.slane %v3331_v9, %v439_v52 }
 0x461   :  { %2778 = vmatmul.mubr.msk.bf16.vlgmr.msra.gmra.mrb[8].mxu0 %vm85_vm1, %v329_v55 }
 0x462   :  { %2805 = vmatprep.mubr.msk.bf16.mxu0 %vm3261_vm0, %v3260_v0  ;;  %2790 = vmatpush3.bf16.msra.mxu0 %v3087_v14 }
 0x463   :  { %2791 = vmatprep.subr.bf16.mxu0 %v3260_v0 }
 0x466   :  { %2792 = vmatpush3.bf16.msra.mxu0 %v3088_v15 }
 0x467   :  { %2793 = vmatprep.subr.bf16.mxu0 %v3260_v0 }
 0x46a   :  { %2794 = vmatpush3.bf16.msra.mxu0 %v3089_v16 }
 0x46b   :  { %2795 = vmatprep.subr.bf16.mxu0 %v3260_v0 }
 0x46e   :  { %2796 = vmatpush3.bf16.msra.mxu0 %v3090_v17 }
 0x46f   :  { %2797 = vmatprep.subr.bf16.mxu0 %v3260_v0 }
 0x472   :  { %2798 = vmatpush3.bf16.msra.mxu0 %v3091_v18 }
 0x473   :  { %2799 = vmatprep.subr.bf16.mxu0 %v3260_v0 }
 0x476   :  { %2800 = vmatpush3.bf16.msra.mxu0 %v3092_v19  ;;  %v628_v19 = vsub.s32 2, %v3323_v7 }
 0x477   :  { %2801 = vmatprep.subr.bf16.mxu0 %v3260_v0 }
 0x47a   :  { %2802 = vmatpush3.bf16.msra.mxu0 %v3093_v50 }
 0x47b   :  { %2803 = vmatprep.subr.bf16.mxu0 %v3260_v0 }
 0x47e   :  { %2804 = vmatpush3.bf16.msra.mxu0 %v3094_v51 }
 0x47f   :  { %2839 = vmatprep.subr.bf16.mxu0 %v3260_v0 }
 0x534   :  { %v379_v58 = vpop.f32.mrb[8].mxu0 }
 0x535   :  { %v390_v59 = vadd.f32 %v389_v57, %v379_v58  ;;  %v2779_v60 = vpop.f32.mrb[9].mxu0 }
 0x536   :  { %v382_v61 = vpop.f32.mrb[10].mxu0 }
 0x537   :  { %v392_v62 = vadd.f32 %v390_v59, %v3312_v3  ;;  %v391_v63 = vadd.f32 %v389_v57, %v382_v61  ;;  %v2780_v1 = vpop.f32.mrb[11].mxu0  ;;  %v3085_v3 = vld [vmem:[#allocation2 + $0x20] sm:$0xff]  }
 0x538   :  { %2782 = vmatpush3.bf16.msra.mxu1 %v3085_v3 }
 0x539   :  { %v393_v2 = vadd.f32 %v391_v63, %v3317_v4  ;;  %v394_v5 = vsel %vm85_vm1, %v392_v62, 0.0  ;;  %v403_v10 = vmul.f32 %v392_v62, %v392_v62  ;;  %2783 = vmatprep.subr.bf16.mxu1 %v3260_v0  ;;  %v3086_v4 = vld [vmem:[#allocation2 + $0x28] sm:$0xff]  }
 0x53a   :  { %395 = vadd.xlane.f32.xlu1 %v394_v5 }
 0x53b   :  { %v397_v6 = vsel %vm85_vm1, %v393_v2, 0.0  ;;  %v405_v11 = vsel %vm85_vm1, %v403_v10, 0.0  ;;  %v404_v12 = vmul.f32 %v393_v2, %v393_v2 }
 0x53c   :  { %398 = vadd.xlane.f32.xlu0 %v397_v6  ;;  %2784 = vmatpush3.bf16.msra.mxu1 %v3086_v4 }
 0x53d   :  { %v408_v13 = vsel %vm85_vm1, %v404_v12, 0.0  ;;  %2809 = vmatprep.subr.bf16.mxu1 %v3260_v0 }
 0x540   :  { %406 = vadd.xlane.f32.xlu0 %v405_v11 }
 0x544   :  { %409 = vadd.xlane.f32.xlu0 %v408_v13 }
 0x54b   :  { %431 = vrot.lane.b32.xlu1 %v389_v57, %s3263_s12 }
 0x55a   :  { %426 = vrot.lane.b32.xlu0 %v389_v57, %s3258_s25 }
 0x55e   :  { %589 = vrot.lane.b32.xlu0 %v389_v57, %s3262_s0 }
 0x5c7   :  { %v396_v20 = vpop.xlane.xlu1 %395 }
 0x5c8   :  { %v401_v25 = vmul.f32 0.03125, %v396_v20  ;;  %v629_v20 = vrot.slane %v3331_v9, %v628_v19 }
 0x5c9   :  { %v399_v22 = vpop.xlane.xlu0 %398 }
 0x5ca   :  { %v413_v27 = vmul.f32 %v401_v25, %v401_v25  ;;  %v402_v28 = vmul.f32 0.03125, %v399_v22  ;;  %v417_v37 = vsub.f32 %v392_v62, %v401_v25  ;;  %v3095_v22 = vld [vmem:[#allocation2 + $0x70] sm:$0xff]   ;;  %v3096_v25 = vld [vmem:[#allocation2 + $0x78] sm:$0xff]  }
 0x5cb   :  { %v432_v45 = vpop.permute.xlu1 %431 }
 0x5cc   :  { %v414_v32 = vmul.f32 %v402_v28, %v402_v28  ;;  %v418_v41 = vsub.f32 %v393_v2, %v402_v28 }
 0x5cd   :  { %v407_v26 = vpop.xlane.xlu0 %406 }
 0x5ce   :  { %v411_v29 = vmul.f32 0.03125, %v407_v26 }
 0x5d0   :  { %v415_v30 = vsub.f32 %v411_v29, %v413_v27 }
 0x5d1   :  { %v410_v31 = vpop.xlane.xlu0 %409 }
 0x5d2   :  { %v419_v33 = vadd.f32 1e-05, %v415_v30  ;;  %v412_v34 = vmul.f32 0.03125, %v410_v31 }
 0x5d4   :  { %3147 = vrsqrt.f32 %v419_v33  ;;  %v416_v35 = vsub.f32 %v412_v34, %v414_v32 }
 0x5d5   :  { %v427_v40 = vpop.permute.xlu0 %426 }
 0x5d6   :  { %v420_v36 = vadd.f32 1e-05, %v416_v35 }
 0x5d8   :  { %3149 = vrsqrt.f32 %v420_v36 }
 0x5d9   :  { %v590_v1 = vpop.permute.xlu0 %589 }
 0x5de   :  { %v3148_v38 = vpop.eup %3147 }
 0x5df   :  { %v423_v39 = vmul.f32 %v3148_v38, %v417_v37 }
 0x5e1   :  { %v429_v44 = vmul.f32 %v427_v40, %v423_v39 }
 0x5e2   :  { %v3150_v42 = vpop.eup %3149 }
 0x5e3   :  { %v424_v43 = vmul.f32 %v3150_v42, %v418_v41  ;;  %v434_v47 = vadd.f32 %v432_v45, %v429_v44 }
 0x5e5   :  { %v430_v46 = vmul.f32 %v427_v40, %v424_v43 }
 0x5e7   :  { %v435_v48 = vadd.f32 %v432_v45, %v430_v46 }
 0x5e9   :  { %v436_v49 = vpack.c.bf16 %v435_v48, %v434_v47 }
 0x5eb   :  { %2786 = vmatmul.mubr.msk.bf16.vlgmr.msra.gmra.mrb[4].mxu1 %vm85_vm1, %v436_v49 }
 0x5ec   :  { %2813 = vmatprep.mubr.msk.bf16.mxu1 %vm3261_vm0, %v3260_v0  ;;  %2810 = vmatpush3.bf16.msra.mxu1 %v3095_v22 }
 0x5ed   :  { %2811 = vmatprep.subr.bf16.mxu1 %v3260_v0 }
 0x5f0   :  { %2812 = vmatpush3.bf16.msra.mxu1 %v3096_v25 }
 0x6be   :  { %v490_v54 = vpop.f32.mrb[4].mxu1 }
 0x6bf   :  { %v491_v55 = vadd.f32 %v490_v54, %v440_v53  ;;  %v2787_v57 = vpop.f32.mrb[5].mxu1 }
 0x6c0   :  { %v493_v58 = vpop.f32.mrb[6].mxu1 }
 0x6c1   :  { %v494_v59 = vadd.f32 %v493_v58, %v440_v53  ;;  %v2788_v60 = vpop.f32.mrb[7].mxu1  ;;  %v497_v61 = vmax.f32 %v491_v55, 0.0  ;;  %v669_v53 = vsub.s32 4, %v3323_v7 }
 0x6c3   :  { %v498_v62 = vmax.f32 %v494_v59, 0.0  ;;  %v670_v54 = vrot.slane %v3331_v9, %v669_v53 }
 0x6c5   :  { %v499_v63 = vpack.c.bf16 %v498_v62, %v497_v61 }
 0x6c7   :  { %2806 = vmatmul.mubr.bf16.vlgmr.msra.gmra.mrb[12].mxu0 %v499_v63 }
 0x6c8   :  { %2843 = vmatprep.mubr.msk.bf16.mxu0 %vm3261_vm0, %v3260_v0 }
 0x79a   :  { %v582_v2 = vpop.f32.mrb[12].mxu0 }
 0x79b   :  { %v592_v5 = vadd.f32 %v590_v1, %v582_v2  ;;  %v2807_v6 = vpop.f32.mrb[13].mxu0 }
 0x79c   :  { %v585_v10 = vpop.f32.mrb[14].mxu0 }
 0x79d   :  { %v594_v11 = vadd.f32 %v592_v5, %v434_v47  ;;  %v593_v12 = vadd.f32 %v590_v1, %v585_v10  ;;  %v2808_v13 = vpop.f32.mrb[15].mxu0 }
 0x79f   :  { %v595_v3 = vadd.f32 %v593_v12, %v435_v48  ;;  %v596_v4 = vsel %vm85_vm1, %v594_v11, 0.0  ;;  %v604_v14 = vmul.f32 %v594_v11, %v594_v11 }
 0x7a0   :  { %597 = vadd.xlane.f32.xlu0 %v596_v4 }
 0x7a1   :  { %v599_v15 = vsel %vm85_vm1, %v595_v3, 0.0  ;;  %v606_v16 = vsel %vm85_vm1, %v604_v14, 0.0  ;;  %v605_v17 = vmul.f32 %v595_v3, %v595_v3 }
 0x7a2   :  { %600 = vadd.xlane.f32.xlu1 %v599_v15 }
 0x7a3   :  { %v609_v18 = vsel %vm85_vm1, %v605_v17, 0.0 }
 0x7a4   :  { %607 = vadd.xlane.f32.xlu0 %v606_v16 }
 0x7a8   :  { %610 = vadd.xlane.f32.xlu0 %v609_v18 }
 0x7be   :  { %633 = vrot.lane.b32.xlu0 %v629_v20, %s3262_s0 }
 0x82d   :  { %v598_v26 = vpop.xlane.xlu0 %597 }
 0x82e   :  { %v602_v27 = vmul.f32 0.03125, %v598_v26 }
 0x82f   :  { %v601_v28 = vpop.xlane.xlu1 %600 }
 0x830   :  { %v614_v30 = vmul.f32 %v602_v27, %v602_v27  ;;  %v603_v31 = vmul.f32 0.03125, %v601_v28  ;;  %v618_v40 = vsub.f32 %v594_v11, %v602_v27 }
 0x831   :  { %v608_v29 = vpop.xlane.xlu0 %607 }
 0x832   :  { %v612_v32 = vmul.f32 0.03125, %v608_v29  ;;  %v615_v35 = vmul.f32 %v603_v31, %v603_v31  ;;  %v619_v43 = vsub.f32 %v595_v3, %v603_v31 }
 0x834   :  { %v616_v33 = vsub.f32 %v612_v32, %v614_v30 }
 0x835   :  { %v611_v34 = vpop.xlane.xlu0 %610 }
 0x836   :  { %v620_v36 = vadd.f32 1e-05, %v616_v33  ;;  %v613_v37 = vmul.f32 0.03125, %v611_v34 }
 0x838   :  { %3151 = vrsqrt.f32 %v620_v36  ;;  %v617_v38 = vsub.f32 %v613_v37, %v615_v35  ;;  %v3097_v36 = vld [vmem:[#allocation2 + $0x80] sm:$0xff]  }
 0x839   :  { %v634_v47 = vpop.permute.xlu0 %633 }
 0x83a   :  { %v621_v39 = vadd.f32 1e-05, %v617_v38  ;;  %v3098_v38 = vld [vmem:[#allocation2 + $0x88] sm:$0xff]  }
 0x83c   :  { %3153 = vrsqrt.f32 %v621_v39 }
 0x842   :  { %v3152_v41 = vpop.eup %3151 }
 0x843   :  { %v624_v42 = vmul.f32 %v3152_v41, %v618_v40 }
 0x845   :  { %v630_v45 = vmul.f32 %v629_v20, %v624_v42  ;;  %v984_v42 = vsub.s32 5, %v3323_v7 }
 0x846   :  { %v3154_v44 = vpop.eup %3153 }
 0x847   :  { %v625_v46 = vmul.f32 %v3154_v44, %v619_v43  ;;  %v3421_v49 = vadd.f32 %v634_v47, %v630_v45  ;;  %v985_v43 = vrot.slane %v3331_v9, %v984_v42 }
 0x849   :  { %v631_v48 = vmul.f32 %v629_v20, %v625_v46 }
 0x84b   :  { %v3423_v50 = vadd.f32 %v634_v47, %v631_v48 }
 0x84d   :  { %v666_v51 = vpack.c.bf16 %v3423_v50, %v3421_v49 }
 0x84f   :  { %2814 = vmatmul.mubr.msk.bf16.vlgmr.msra.gmra.mrb[8].mxu1 %vm85_vm1, %v666_v51 }
 0x922   :  { %v720_v55 = vpop.f32.mrb[8].mxu1 }
 0x923   :  { %v721_v57 = vadd.f32 %v720_v55, %v670_v54  ;;  %v2815_v58 = vpop.f32.mrb[9].mxu1 }
 0x924   :  { %v723_v59 = vpop.f32.mrb[10].mxu1 }
 0x925   :  { %v724_v60 = vadd.f32 %v723_v59, %v670_v54  ;;  %v2816_v61 = vpop.f32.mrb[11].mxu1  ;;  %2821 = vmatprep.mubr.msk.f32.mxu1 %vm85_vm1, %v721_v57 }
 0x927   :  { %v3051_v62 = vpack.i.bf16 %v724_v60, %v721_v57 }
 0x929   :  { %3052 = vrot.lane.b32.xlu1 %v3051_v62, %s3262_s0 }
 0x99b   :  { %v3053_v63 = vpop.permute.xlu1 %3052 }
 0x99c   :  { %v3055_v1 = vunpack.i.h.bf16 %v3053_v63  ;;  %v3054_v2 = vunpack.i.l.bf16 %v3053_v63  ;;  %v3101_v63 = vld [vmem:[#allocation2 + $0xa0] sm:$0xff]  }
 0x99e   :  { %v3001_v5 = vpack.c.bf16 %v3055_v1, %v3054_v2  ;;  %v3102_v1 = vld [vmem:[#allocation2 + $0xa8] sm:$0xff]   ;;  %v3103_v2 = vld [vmem:[#allocation2 + $0xb0] sm:$0xff]  }
 0x9a0   :  { %3003 = vmatprep.subr.msk.bf16.mxu1 %vm3339_vm2, %v3001_v5 }
 0x9a1   :  { %3006 = vmatpush3.bf16.xpose.msk.msra.mxu1 %vm3339_vm2, %v3001_v5  ;;  %v3104_v5 = vld [vmem:[#allocation2 + $0xb8] sm:$0xff]  }
 0x9a8   :  { %2822 = vmatmul.mubr.msk.f32.vlgmr.msra.gmra.mrb[2].mxu1 %vm85_vm1, %v724_v60 }
 0xa7b   :  { %v2823_v6 = vpop.f32.mrb[2].mxu1 }
 0xa7c   :  { %v813_v10 = vadd.f32 %v2823_v6, %v3354_v23  ;;  %v807_v11 = vpop.f32.mrb[3].mxu1  ;;  %v3105_v6 = vld [vmem:[#allocation2 + $0xc0] sm:$0xff]  }
 0xa7d   :  { %v808_v12 = vadd.f32 %v807_v11, %v3359_v24 }
 0xa7e   :  { %v819_v13 = vsel %vm219_vm3, %v813_v10, -inf }
 0xa7f   :  { %820 = vmax.xlane.f32.xlu1 %v819_v13  ;;  %v816_v3 = vsel %vm219_vm3, %v808_v12, -inf }
 0xa80   :  { %817 = vmax.xlane.f32.xlu0 %v816_v3 }
 0xa90   :  { %3057 = vrot.lane.b32.xlu1 %v3051_v62, %s3258_s25 }
 0xa94   :  { %1021 = vrot.lane.b32.xlu1 %v985_v43, %s3258_s25 }
 0xa98   :  { %1184 = vrot.lane.b32.xlu1 %v985_v43, %s3262_s0 }
 0xb0c   :  { %v821_v4 = vpop.xlane.xlu1 %820 }
 0xb0d   :  { %v823_v14 = vsub.f32 %v813_v10, %v821_v4  ;;  %v818_v15 = vpop.xlane.xlu0 %817  ;;  %v3106_v10 = vld [vmem:[#allocation2 + $0xc8] sm:$0xff]  }
 0xb0e   :  { %v822_v16 = vsub.f32 %v808_v12, %v818_v15 }
 0xb0f   :  { %v826_v17 = vmul.f32 1.442695, %v823_v14 }
 0xb10   :  { %v824_v18 = vmul.f32 1.442695, %v822_v16  ;;  %v3058_v20 = vpop.permute.xlu1 %3057 }
 0xb11   :  { %v3060_v22 = vunpack.i.h.bf16 %v3058_v20  ;;  %v3059_v25 = vunpack.i.l.bf16 %v3058_v20 }
 0xb12   :  { %3155 = vpow2.f32 %v824_v18 }
 0xb13   :  { %v3007_v26 = vpack.c.bf16 %v3060_v22, %v3059_v25  ;;  %3157 = vpow2.f32 %v826_v17 }
 0xb15   :  { %3008 = vmatprep.subr.bf16.mxu1 %v3007_v26 }
 0xb16   :  { %3010 = vmatpush3.bf16.msra.mxu1 %v3007_v26 }
 0xb17   :  { %2831 = vmatprep.subr.bf16.mxu1 %v3260_v0 }
 0xb1c   :  { %v3156_v27 = vpop.eup %3155 }
 0xb1d   :  { %v828_v28 = vsel %vm219_vm3, %v3156_v27, 0.0  ;;  %v3158_v29 = vpop.eup %3157 }
 0xb1e   :  { %829 = vadd.xlane.f32.xlu0 %v828_v28  ;;  %v831_v30 = vsel %vm219_vm3, %v3158_v29, 0.0 }
 0xb22   :  { %832 = vadd.xlane.f32.xlu0 %v831_v30  ;;  %v1022_v30 = vpop.permute.xlu1 %1021 }
 0xbab   :  { %v830_v31 = vpop.xlane.xlu0 %829 }
 0xbac   :  { %3159 = vrcp.f32 %v830_v31 }
 0xbaf   :  { %v833_v32 = vpop.xlane.xlu0 %832 }
 0xbb0   :  { %3161 = vrcp.f32 %v833_v32 }
 0xbb6   :  { %v3160_v33 = vpop.eup %3159 }
 0xbb7   :  { %v836_v34 = vmul.f32 %v3160_v33, %v3156_v27 }
 0xbb9   :  { %2828 = vmatprep.mubr.msk.f32.mxu1 %vm219_vm3, %v836_v34 }
 0xbba   :  { %v3162_v35 = vpop.eup %3161 }
 0xbbb   :  { %v837_v37 = vmul.f32 %v3162_v35, %v3158_v29 }
 0xbbd   :  { %2829 = vmatmul.mubr.msk.f32.vlgmr.msra.gmra.mrb[12].mxu1 %vm219_vm3, %v837_v37 }
 0xbbe   :  { %2832 = vmatpush3.bf16.msra.mxu1 %v3097_v36  ;;  %2835 = vmatprep.mubr.msk.bf16.mxu1 %vm3261_vm0, %v3260_v0 }
 0xbbf   :  { %2833 = vmatprep.subr.bf16.mxu1 %v3260_v0 }
 0xbc2   :  { %2834 = vmatpush3.bf16.msra.mxu1 %v3098_v38 }
 0xbc3   :  { %2847 = vmatprep.subr.bf16.mxu1 %v3260_v0 }
 0xc90   :  { %v2830_v39 = vpop.f32.mrb[12].mxu1 }
 0xc91   :  { %v916_v40 = vpop.f32.mrb[13].mxu1 }
 0xc92   :  { %v925_v41 = vpack.c.bf16 %v2830_v39, %v916_v40  ;;  %v3107_v40 = vld [vmem:[#allocation2 + $0xd0] sm:$0xff]  }
 0xc94   :  { %2836 = vmatmul.mubr.msk.bf16.vlgmr.msra.gmra.mrb[16].mxu1 %vm85_vm1, %v925_v41  ;;  %v3108_v41 = vld [vmem:[#allocation2 + $0xd8] sm:$0xff]  }
 0xc95   :  { %2863 = vmatprep.mubr.msk.bf16.mxu1 %vm3261_vm0, %v3260_v0  ;;  %2848 = vmatpush3.bf16.msra.mxu1 %v3101_v63 }
 0xc96   :  { %2849 = vmatprep.subr.bf16.mxu1 %v3260_v0 }
 0xc99   :  { %2850 = vmatpush3.bf16.msra.mxu1 %v3102_v1 }
 0xc9a   :  { %2851 = vmatprep.subr.bf16.mxu1 %v3260_v0 }
 0xc9d   :  { %2852 = vmatpush3.bf16.msra.mxu1 %v3103_v2 }
 0xc9e   :  { %2853 = vmatprep.subr.bf16.mxu1 %v3260_v0 }
 0xca1   :  { %2854 = vmatpush3.bf16.msra.mxu1 %v3104_v5 }
 0xca2   :  { %2855 = vmatprep.subr.bf16.mxu1 %v3260_v0 }
 0xca5   :  { %2856 = vmatpush3.bf16.msra.mxu1 %v3105_v6 }
 0xca6   :  { %2857 = vmatprep.subr.bf16.mxu1 %v3260_v0 }
 0xca9   :  { %2858 = vmatpush3.bf16.msra.mxu1 %v3106_v10 }
 0xcaa   :  { %2859 = vmatprep.subr.bf16.mxu1 %v3260_v0 }
 0xcad   :  { %2860 = vmatpush3.bf16.msra.mxu1 %v3107_v40 }
 0xcae   :  { %2861 = vmatprep.subr.bf16.mxu1 %v3260_v0 }
 0xcb1   :  { %2862 = vmatpush3.bf16.msra.mxu1 %v3108_v41 }
 0xcb2   :  { %2897 = vmatprep.subr.bf16.mxu1 %v3260_v0 }
 0xd67   :  { %v975_v44 = vpop.f32.mrb[16].mxu1 }
 0xd68   :  { %v986_v45 = vadd.f32 %v985_v43, %v975_v44  ;;  %v2837_v46 = vpop.f32.mrb[17].mxu1 }
 0xd69   :  { %v978_v47 = vpop.f32.mrb[18].mxu1 }
 0xd6a   :  { %v988_v48 = vadd.f32 %v986_v45, %v3421_v49  ;;  %v987_v51 = vadd.f32 %v985_v43, %v978_v47  ;;  %v2838_v54 = vpop.f32.mrb[19].mxu1  ;;  %v3099_v49 = vld [vmem:[#allocation2 + $0x90] sm:$0xff]  }
 0xd6b   :  { %2840 = vmatpush3.bf16.msra.mxu0 %v3099_v49 }
 0xd6c   :  { %v989_v55 = vadd.f32 %v987_v51, %v3423_v50  ;;  %v990_v57 = vsel %vm85_vm1, %v988_v48, 0.0  ;;  %v998_v59 = vmul.f32 %v988_v48, %v988_v48  ;;  %2841 = vmatprep.subr.bf16.mxu0 %v3260_v0  ;;  %v3100_v50 = vld [vmem:[#allocation2 + $0x98] sm:$0xff]  }
 0xd6d   :  { %991 = vadd.xlane.f32.xlu0 %v990_v57 }
 0xd6e   :  { %v993_v58 = vsel %vm85_vm1, %v989_v55, 0.0  ;;  %v1000_v60 = vsel %vm85_vm1, %v998_v59, 0.0  ;;  %v999_v61 = vmul.f32 %v989_v55, %v989_v55  ;;  %v1185_v59 = vpop.permute.xlu1 %1184 }
 0xd6f   :  { %2842 = vmatpush3.bf16.msra.mxu0 %v3100_v50 }
 0xd70   :  { %v1003_v62 = vsel %vm85_vm1, %v999_v61, 0.0  ;;  %2867 = vmatprep.subr.bf16.mxu0 %v3260_v0 }
 0xd71   :  { %994 = vadd.xlane.f32.xlu0 %v993_v58 }
 0xd75   :  { %1001 = vadd.xlane.f32.xlu0 %v1000_v60 }
 0xd79   :  { %1004 = vadd.xlane.f32.xlu0 %v1003_v62 }
 0xd8f   :  { %1026 = vrot.lane.b32.xlu0 %v985_v43, %s3263_s12  ;;  %v1034_v43 = vsub.s32 7, %v3323_v7 }
 0xd91   :  { %v1035_v44 = vrot.slane %v3331_v9, %v1034_v43 }
 0xdfa   :  { %v992_v11 = vpop.xlane.xlu0 %991 }
 0xdfb   :  { %v996_v13 = vmul.f32 0.03125, %v992_v11 }
 0xdfd   :  { %v1008_v4 = vmul.f32 %v996_v13, %v996_v13  ;;  %v1012_v27 = vsub.f32 %v988_v48, %v996_v13 }
 0xdfe   :  { %v995_v12 = vpop.xlane.xlu0 %994 }
 0xdff   :  { %v997_v14 = vmul.f32 0.03125, %v995_v12 }
 0xe01   :  { %v1009_v18 = vmul.f32 %v997_v14, %v997_v14  ;;  %v1013_v31 = vsub.f32 %v989_v55, %v997_v14  ;;  %v3109_v14 = vld [vmem:[#allocation2 + $0xe0] sm:$0xff]  }
 0xe02   :  { %v1002_v3 = vpop.xlane.xlu0 %1001 }
 0xe03   :  { %v1006_v15 = vmul.f32 0.03125, %v1002_v3  ;;  %v1223_v3 = vsub.s32 6, %v3323_v7 }
 0xe05   :  { %v1010_v16 = vsub.f32 %v1006_v15, %v1008_v4  ;;  %v1224_v4 = vrot.slane %v3331_v9, %v1223_v3  ;;  %v3110_v15 = vld [vmem:[#allocation2 + $0xe8] sm:$0xff]  }
 0xe06   :  { %v1005_v17 = vpop.xlane.xlu0 %1004 }
 0xe07   :  { %v1014_v20 = vadd.f32 1e-05, %v1010_v16  ;;  %v1007_v22 = vmul.f32 0.03125, %v1005_v17 }
 0xe09   :  { %3163 = vrsqrt.f32 %v1014_v20  ;;  %v1011_v25 = vsub.f32 %v1007_v22, %v1009_v18 }
 0xe0a   :  { %v1027_v35 = vpop.permute.xlu0 %1026 }
 0xe0b   :  { %v1015_v26 = vadd.f32 1e-05, %v1011_v25 }
 0xe0d   :  { %3165 = vrsqrt.f32 %v1015_v26 }
 0xe13   :  { %v3164_v28 = vpop.eup %3163 }
 0xe14   :  { %v1018_v29 = vmul.f32 %v3164_v28, %v1012_v27 }
 0xe16   :  { %v1024_v34 = vmul.f32 %v1022_v30, %v1018_v29 }
 0xe17   :  { %v3166_v32 = vpop.eup %3165 }
 0xe18   :  { %v1019_v33 = vmul.f32 %v3166_v32, %v1013_v31  ;;  %v1029_v37 = vadd.f32 %v1027_v35, %v1024_v34 }
 0xe1a   :  { %v1025_v36 = vmul.f32 %v1022_v30, %v1019_v33 }
 0xe1c   :  { %v1030_v38 = vadd.f32 %v1027_v35, %v1025_v36 }
 0xe1e   :  { %v1031_v39 = vpack.c.bf16 %v1030_v38, %v1029_v37 }
 0xe20   :  { %2844 = vmatmul.mubr.msk.bf16.vlgmr.msra.gmra.mrb[16].mxu0 %vm85_vm1, %v1031_v39 }
 0xe21   :  { %2871 = vmatprep.mubr.msk.bf16.mxu0 %vm3261_vm0, %v3260_v0  ;;  %2868 = vmatpush3.bf16.msra.mxu0 %v3109_v14 }
 0xe22   :  { %2869 = vmatprep.subr.bf16.mxu0 %v3260_v0 }
 0xe25   :  { %2870 = vmatpush3.bf16.msra.mxu0 %v3110_v15 }
 0xef3   :  { %v1085_v45 = vpop.f32.mrb[16].mxu0 }
 0xef4   :  { %v1086_v46 = vadd.f32 %v1085_v45, %v1035_v44  ;;  %v2845_v47 = vpop.f32.mrb[17].mxu0 }
 0xef5   :  { %v1088_v48 = vpop.f32.mrb[18].mxu0  ;;  %v3508_v47 = vld [vmem:[%s3683_s3 + $0x8] sm:$0xff] }
 0xef6   :  { %v1089_v51 = vadd.f32 %v1088_v48, %v1035_v44  ;;  %v2846_v54 = vpop.f32.mrb[19].mxu0  ;;  %v1092_v55 = vmax.f32 %v1086_v46, 0.0  ;;  %v1265_v48 = vrot.slane %v3508_v47, %v3326_v8 }
 0xef8   :  { %v1093_v57 = vmax.f32 %v1089_v51, 0.0 }
 0xefa   :  { %v1094_v58 = vpack.c.bf16 %v1093_v57, %v1092_v55 }
 0xefc   :  { %2864 = vmatmul.mubr.bf16.vlgmr.msra.gmra.mrb[20].mxu1 %v1094_v58 }
 0xefd   :  { %2901 = vmatprep.mubr.msk.bf16.mxu1 %vm3261_vm0, %v3260_v0 }
 0xfcf   :  { %v1177_v60 = vpop.f32.mrb[20].mxu1 }
 0xfd0   :  { %v1187_v61 = vadd.f32 %v1185_v59, %v1177_v60  ;;  %v2865_v62 = vpop.f32.mrb[21].mxu1 }
 0xfd1   :  { %v1180_v49 = vpop.f32.mrb[22].mxu1 }
 0xfd2   :  { %v1189_v50 = vadd.f32 %v1187_v61, %v1029_v37  ;;  %v1188_v63 = vadd.f32 %v1185_v59, %v1180_v49  ;;  %v2866_v1 = vpop.f32.mrb[23].mxu1 }
 0xfd4   :  { %v1190_v2 = vadd.f32 %v1188_v63, %v1030_v38  ;;  %v1191_v5 = vsel %vm85_vm1, %v1189_v50, 0.0  ;;  %v1199_v6 = vmul.f32 %v1189_v50, %v1189_v50 }
 0xfd5   :  { %1192 = vadd.xlane.f32.xlu1 %v1191_v5 }
 0xfd6   :  { %v1194_v10 = vsel %vm85_vm1, %v1190_v2, 0.0  ;;  %v1201_v11 = vsel %vm85_vm1, %v1199_v6, 0.0  ;;  %v1200_v12 = vmul.f32 %v1190_v2, %v1190_v2 }
 0xfd7   :  { %1195 = vadd.xlane.f32.xlu0 %v1194_v10 }
 0xfd8   :  { %v1204_v13 = vsel %vm85_vm1, %v1200_v12, 0.0 }
 0xfd9   :  { %1202 = vadd.xlane.f32.xlu1 %v1201_v11 }
 0xfdd   :  { %1205 = vadd.xlane.f32.xlu1 %v1204_v13 }
 0xfee   :  { %1228 = vrot.lane.b32.xlu1 %v1224_v4, %s3262_s0 }
0x1062   :  { %v1193_v16 = vpop.xlane.xlu1 %1192 }
0x1063   :  { %v1197_v17 = vmul.f32 0.03125, %v1193_v16 }
0x1064   :  { %v1196_v18 = vpop.xlane.xlu0 %1195 }
0x1065   :  { %v1209_v22 = vmul.f32 %v1197_v17, %v1197_v17  ;;  %v1198_v25 = vmul.f32 0.03125, %v1196_v18  ;;  %v1213_v33 = vsub.f32 %v1189_v50, %v1197_v17 }
0x1066   :  { %v1203_v20 = vpop.xlane.xlu1 %1202 }
0x1067   :  { %v1207_v26 = vmul.f32 0.03125, %v1203_v20  ;;  %v1210_v29 = vmul.f32 %v1198_v25, %v1198_v25  ;;  %v1214_v36 = vsub.f32 %v1190_v2, %v1198_v25 }
0x1069   :  { %v1211_v27 = vsub.f32 %v1207_v26, %v1209_v22 }
0x106a   :  { %v1206_v28 = vpop.xlane.xlu1 %1205 }
0x106b   :  { %v1215_v30 = vadd.f32 1e-05, %v1211_v27  ;;  %v1208_v9 = vmul.f32 0.03125, %v1206_v28 }
0x106d   :  { %3167 = vrsqrt.f32 %v1215_v30  ;;  %v1212_v31 = vsub.f32 %v1208_v9, %v1210_v29  ;;  %v3111_v9 = vld [vmem:[#allocation2 + $0xf0] sm:$0xff]  }
0x106e   :  { %v1229_v40 = vpop.permute.xlu1 %1228 }
0x106f   :  { %v1216_v32 = vadd.f32 1e-05, %v1212_v31 }
0x1071   :  { %3169 = vrsqrt.f32 %v1216_v32  ;;  %v3112_v32 = vld [vmem:[#allocation2 + $0xf8] sm:$0xff]  }
0x1077   :  { %v3168_v34 = vpop.eup %3167 }
0x1078   :  { %v1219_v35 = vmul.f32 %v3168_v34, %v1213_v33 }
0x107a   :  { %v1225_v38 = vmul.f32 %v1224_v4, %v1219_v35 }
0x107b   :  { %v3170_v37 = vpop.eup %3169 }
0x107c   :  { %v1220_v39 = vmul.f32 %v3170_v37, %v1214_v36  ;;  %v3498_v44 = vadd.f32 %v1229_v40, %v1225_v38  ;;  %v1580_v36 = vrot.slane %v3508_v47, %v3379_v56 }
0x107e   :  { %v1226_v41 = vmul.f32 %v1224_v4, %v1220_v39 }
0x1080   :  { %v3500_v45 = vadd.f32 %v1229_v40, %v1226_v41 }
0x1082   :  { %v1261_v46 = vpack.c.bf16 %v3500_v45, %v3498_v44 }
0x1084   :  { %2872 = vmatmul.mubr.msk.bf16.vlgmr.msra.gmra.mrb[20].mxu0 %vm85_vm1, %v1261_v46 }
0x1157   :  { %v1315_v51 = vpop.f32.mrb[20].mxu0 }
0x1158   :  { %v1316_v54 = vadd.f32 %v1315_v51, %v1265_v48  ;;  %v2873_v55 = vpop.f32.mrb[21].mxu0 }
0x1159   :  { %v1318_v57 = vpop.f32.mrb[22].mxu0 }
0x115a   :  { %v1319_v58 = vadd.f32 %v1318_v57, %v1265_v48  ;;  %v2874_v59 = vpop.f32.mrb[23].mxu0  ;;  %2879 = vmatprep.mubr.msk.f32.mxu0 %vm85_vm1, %v1316_v54 }
0x115c   :  { %v3061_v60 = vpack.i.bf16 %v1319_v58, %v1316_v54 }
0x115e   :  { %3062 = vrot.lane.b32.xlu0 %v3061_v60, %s3262_s0 }
0x11d0   :  { %v3063_v61 = vpop.permute.xlu0 %3062 }
0x11d1   :  { %v3065_v62 = vunpack.i.h.bf16 %v3063_v61  ;;  %v3064_v49 = vunpack.i.l.bf16 %v3063_v61  ;;  %v3115_v61 = vld [vmem:[#allocation2 + $0x110] sm:$0xff]  }
0x11d3   :  { %v3011_v50 = vpack.c.bf16 %v3065_v62, %v3064_v49  ;;  %v3116_v62 = vld [vmem:[#allocation2 + $0x118] sm:$0xff]   ;;  %v3117_v49 = vld [vmem:[#allocation2 + $0x120] sm:$0xff]  }
0x11d5   :  { %3013 = vmatprep.subr.msk.bf16.mxu0 %vm3339_vm2, %v3011_v50 }
0x11d6   :  { %3016 = vmatpush3.bf16.xpose.msk.msra.mxu0 %vm3339_vm2, %v3011_v50  ;;  %v3118_v50 = vld [vmem:[#allocation2 + $0x128] sm:$0xff]  }
0x11dd   :  { %2880 = vmatmul.mubr.msk.f32.vlgmr.msra.gmra.mrb[6].mxu0 %vm85_vm1, %v1319_v58 }
0x12b0   :  { %v2881_v63 = vpop.f32.mrb[6].mxu0 }
0x12b1   :  { %v1408_v1 = vadd.f32 %v2881_v63, %v3354_v23  ;;  %v1402_v2 = vpop.f32.mrb[7].mxu0  ;;  %v3119_v63 = vld [vmem:[#allocation2 + $0x130] sm:$0xff]  }
0x12b2   :  { %v1403_v5 = vadd.f32 %v1402_v2, %v3359_v24 }
0x12b3   :  { %v1414_v6 = vsel %vm219_vm3, %v1408_v1, -inf }
0x12b4   :  { %1415 = vmax.xlane.f32.xlu0 %v1414_v6  ;;  %v1411_v10 = vsel %vm219_vm3, %v1403_v5, -inf }
0x12b5   :  { %1412 = vmax.xlane.f32.xlu1 %v1411_v10 }
0x1341   :  { %v1416_v11 = vpop.xlane.xlu0 %1415 }
0x1342   :  { %v1418_v12 = vsub.f32 %v1408_v1, %v1416_v11  ;;  %v1413_v13 = vpop.xlane.xlu1 %1412  ;;  %v3120_v1 = vld [vmem:[#allocation2 + $0x138] sm:$0xff]  }
0x1343   :  { %v1417_v4 = vsub.f32 %v1403_v5, %v1413_v13 }
0x1344   :  { %v1421_v14 = vmul.f32 1.442695, %v1418_v12 }
0x1345   :  { %v1419_v15 = vmul.f32 1.442695, %v1417_v4 }
0x1346   :  { %3171 = vpow2.f32 %v1421_v14 }
0x1347   :  { %3173 = vpow2.f32 %v1419_v15 }
0x1350   :  { %v3172_v16 = vpop.eup %3171 }
0x1351   :  { %v3174_v17 = vpop.eup %3173  ;;  %v1426_v23 = vsel %vm219_vm3, %v3172_v16, 0.0 }
0x1352   :  { %1427 = vadd.xlane.f32.xlu0 %v1426_v23  ;;  %v1423_v24 = vsel %vm219_vm3, %v3174_v17, 0.0 }
0x1353   :  { %1424 = vadd.xlane.f32.xlu1 %v1423_v24 }
0x1364   :  { %3067 = vrot.lane.b32.xlu1 %v3061_v60, %s3258_s25 }
0x1368   :  { %1616 = vrot.lane.b32.xlu1 %v1580_v36, %s3258_s25 }
0x136c   :  { %1779 = vrot.lane.b32.xlu1 %v1580_v36, %s3262_s0 }
0x13df   :  { %v1428_v18 = vpop.xlane.xlu0 %1427 }
0x13e0   :  { %3175 = vrcp.f32 %v1428_v18  ;;  %v1425_v20 = vpop.xlane.xlu1 %1424 }
0x13e1   :  { %3177 = vrcp.f32 %v1425_v20 }
0x13e4   :  { %v3068_v22 = vpop.permute.xlu1 %3067 }
0x13e5   :  { %v3070_v25 = vunpack.i.h.bf16 %v3068_v22  ;;  %v3069_v26 = vunpack.i.l.bf16 %v3068_v22 }
0x13e7   :  { %v3017_v27 = vpack.c.bf16 %v3070_v25, %v3069_v26 }
0x13e8   :  { %v1617_v25 = vpop.permute.xlu1 %1616 }
0x13e9   :  { %3018 = vmatprep.subr.bf16.mxu0 %v3017_v27 }
0x13ea   :  { %v3176_v28 = vpop.eup %3175  ;;  %3020 = vmatpush3.bf16.msra.mxu0 %v3017_v27 }
0x13eb   :  { %v3178_v29 = vpop.eup %3177  ;;  %2889 = vmatprep.subr.bf16.mxu0 %v3260_v0  ;;  %v1432_v31 = vmul.f32 %v3176_v28, %v3172_v16 }
0x13ec   :  { %v1431_v30 = vmul.f32 %v3178_v29, %v3174_v17 }
0x13ee   :  { %2886 = vmatprep.mubr.msk.f32.mxu0 %vm219_vm3, %v1431_v30 }
0x13ef   :  { %2887 = vmatmul.mubr.msk.f32.vlgmr.msra.gmra.mrb[24].mxu0 %vm219_vm3, %v1432_v31 }
0x13f0   :  { %2890 = vmatpush3.bf16.msra.mxu0 %v3111_v9  ;;  %2893 = vmatprep.mubr.msk.bf16.mxu0 %vm3261_vm0, %v3260_v0 }
0x13f1   :  { %2891 = vmatprep.subr.bf16.mxu0 %v3260_v0 }
0x13f4   :  { %2892 = vmatpush3.bf16.msra.mxu0 %v3112_v32 }
0x13f5   :  { %2905 = vmatprep.subr.bf16.mxu0 %v3260_v0 }
0x14c2   :  { %v2888_v33 = vpop.f32.mrb[24].mxu0 }
0x14c3   :  { %v1511_v34 = vpop.f32.mrb[25].mxu0 }
0x14c4   :  { %v1520_v35 = vpack.c.bf16 %v2888_v33, %v1511_v34  ;;  %v3121_v34 = vld [vmem:[#allocation2 + $0x140] sm:$0xff]  }
0x14c6   :  { %2894 = vmatmul.mubr.msk.bf16.vlgmr.msra.gmra.mrb[28].mxu0 %vm85_vm1, %v1520_v35  ;;  %v3122_v35 = vld [vmem:[#allocation2 + $0x148] sm:$0xff]  }
0x14c7   :  { %2921 = vmatprep.mubr.msk.bf16.mxu0 %vm3261_vm0, %v3260_v0  ;;  %2906 = vmatpush3.bf16.msra.mxu0 %v3115_v61 }
0x14c8   :  { %2907 = vmatprep.subr.bf16.mxu0 %v3260_v0 }
0x14cb   :  { %2908 = vmatpush3.bf16.msra.mxu0 %v3116_v62 }
0x14cc   :  { %2909 = vmatprep.subr.bf16.mxu0 %v3260_v0 }
0x14cf   :  { %2910 = vmatpush3.bf16.msra.mxu0 %v3117_v49 }
0x14d0   :  { %2911 = vmatprep.subr.bf16.mxu0 %v3260_v0 }
0x14d3   :  { %2912 = vmatpush3.bf16.msra.mxu0 %v3118_v50 }
0x14d4   :  { %2913 = vmatprep.subr.bf16.mxu0 %v3260_v0 }
0x14d7   :  { %2914 = vmatpush3.bf16.msra.mxu0 %v3119_v63 }
0x14d8   :  { %2915 = vmatprep.subr.bf16.mxu0 %v3260_v0 }
0x14db   :  { %2916 = vmatpush3.bf16.msra.mxu0 %v3120_v1 }
0x14dc   :  { %2917 = vmatprep.subr.bf16.mxu0 %v3260_v0 }
0x14df   :  { %2918 = vmatpush3.bf16.msra.mxu0 %v3121_v34 }
0x14e0   :  { %2919 = vmatprep.subr.bf16.mxu0 %v3260_v0 }
0x14e3   :  { %2920 = vmatpush3.bf16.msra.mxu0 %v3122_v35 }
0x14e4   :  { %2955 = vmatprep.subr.bf16.mxu0 %v3260_v0 }
0x1599   :  { %v1570_v37 = vpop.f32.mrb[28].mxu0 }
0x159a   :  { %v1581_v38 = vadd.f32 %v1580_v36, %v1570_v37  ;;  %v2895_v39 = vpop.f32.mrb[29].mxu0 }
0x159b   :  { %v1573_v40 = vpop.f32.mrb[30].mxu0 }
0x159c   :  { %v1583_v41 = vadd.f32 %v1581_v38, %v3498_v44  ;;  %v1582_v46 = vadd.f32 %v1580_v36, %v1573_v40  ;;  %v2896_v48 = vpop.f32.mrb[31].mxu0  ;;  %v3113_v44 = vld [vmem:[#allocation2 + $0x100] sm:$0xff]  }
0x159d   :  { %2898 = vmatpush3.bf16.msra.mxu1 %v3113_v44 }
0x159e   :  { %v1584_v51 = vadd.f32 %v1582_v46, %v3500_v45  ;;  %v1585_v54 = vsel %vm85_vm1, %v1583_v41, 0.0  ;;  %v1593_v57 = vmul.f32 %v1583_v41, %v1583_v41  ;;  %2899 = vmatprep.subr.bf16.mxu1 %v3260_v0  ;;  %v3114_v45 = vld [vmem:[#allocation2 + $0x108] sm:$0xff]  }
0x159f   :  { %1586 = vadd.xlane.f32.xlu0 %v1585_v54 }
0x15a0   :  { %v1588_v55 = vsel %vm85_vm1, %v1584_v51, 0.0  ;;  %v1595_v58 = vsel %vm85_vm1, %v1593_v57, 0.0  ;;  %v1594_v59 = vmul.f32 %v1584_v51, %v1584_v51 }
0x15a1   :  { %2900 = vmatpush3.bf16.msra.mxu1 %v3114_v45 }
0x15a2   :  { %v1598_v60 = vsel %vm85_vm1, %v1594_v59, 0.0  ;;  %2925 = vmatprep.subr.bf16.mxu1 %v3260_v0 }
0x15a3   :  { %1589 = vadd.xlane.f32.xlu0 %v1588_v55  ;;  %v1780_v55 = vpop.permute.xlu1 %1779 }
0x15a7   :  { %1596 = vadd.xlane.f32.xlu0 %v1595_v58 }
0x15ab   :  { %1599 = vadd.xlane.f32.xlu0 %v1598_v60 }
0x15c1   :  { %1621 = vrot.lane.b32.xlu0 %v1580_v36, %s3263_s12  ;;  %v1630_v36 = vrot.slane %v3508_v47, %v439_v52 }
0x162c   :  { %v1587_v2 = vpop.xlane.xlu0 %1586 }
0x162d   :  { %v1591_v6 = vmul.f32 0.03125, %v1587_v2 }
0x162f   :  { %v1603_v11 = vmul.f32 %v1591_v6, %v1591_v6  ;;  %v1607_v18 = vsub.f32 %v1583_v41, %v1591_v6  ;;  %v3123_v6 = vld [vmem:[#allocation2 + $0x150] sm:$0xff]  }
0x1630   :  { %v1590_v5 = vpop.xlane.xlu0 %1589 }
0x1631   :  { %v1592_v12 = vmul.f32 0.03125, %v1590_v5  ;;  %v1819_v5 = vrot.slane %v3508_v47, %v628_v19 }
0x1633   :  { %v1604_v15 = vmul.f32 %v1592_v12, %v1592_v12  ;;  %v1608_v26 = vsub.f32 %v1584_v51, %v1592_v12 }
0x1634   :  { %v1597_v10 = vpop.xlane.xlu0 %1596 }
0x1635   :  { %v1601_v13 = vmul.f32 0.03125, %v1597_v10  ;;  %v3124_v10 = vld [vmem:[#allocation2 + $0x158] sm:$0xff]  }
0x1637   :  { %v1605_v4 = vsub.f32 %v1601_v13, %v1603_v11 }
0x1638   :  { %v1600_v14 = vpop.xlane.xlu0 %1599 }
0x1639   :  { %v1609_v16 = vadd.f32 1e-05, %v1605_v4  ;;  %v1602_v17 = vmul.f32 0.03125, %v1600_v14 }
0x163b   :  { %3179 = vrsqrt.f32 %v1609_v16  ;;  %v1606_v23 = vsub.f32 %v1602_v17, %v1604_v15 }
0x163c   :  { %v1622_v30 = vpop.permute.xlu0 %1621 }
0x163d   :  { %v1610_v24 = vadd.f32 1e-05, %v1606_v23 }
0x163f   :  { %3181 = vrsqrt.f32 %v1610_v24 }
0x1645   :  { %v3180_v20 = vpop.eup %3179 }
0x1646   :  { %v1613_v22 = vmul.f32 %v3180_v20, %v1607_v18 }
0x1648   :  { %v1619_v29 = vmul.f32 %v1617_v25, %v1613_v22 }
0x1649   :  { %v3182_v27 = vpop.eup %3181 }
0x164a   :  { %v1614_v28 = vmul.f32 %v3182_v27, %v1608_v26  ;;  %v1624_v31 = vadd.f32 %v1622_v30, %v1619_v29 }
0x164c   :  { %v1620_v9 = vmul.f32 %v1617_v25, %v1614_v28 }
0x164e   :  { %v1625_v32 = vadd.f32 %v1622_v30, %v1620_v9 }
0x1650   :  { %v1626_v33 = vpack.c.bf16 %v1625_v32, %v1624_v31 }
0x1652   :  { %2902 = vmatmul.mubr.msk.bf16.vlgmr.msra.gmra.mrb[24].mxu1 %vm85_vm1, %v1626_v33 }
0x1653   :  { %2929 = vmatprep.mubr.msk.bf16.mxu1 %vm3261_vm0, %v3260_v0  ;;  %2926 = vmatpush3.bf16.msra.mxu1 %v3123_v6 }
0x1654   :  { %2927 = vmatprep.subr.bf16.mxu1 %v3260_v0 }
0x1657   :  { %2928 = vmatpush3.bf16.msra.mxu1 %v3124_v10 }
0x1725   :  { %v1680_v37 = vpop.f32.mrb[24].mxu1 }
0x1726   :  { %v1681_v38 = vadd.f32 %v1680_v37, %v1630_v36  ;;  %v2903_v39 = vpop.f32.mrb[25].mxu1 }
0x1727   :  { %v1683_v40 = vpop.f32.mrb[26].mxu1 }
0x1728   :  { %v1684_v41 = vadd.f32 %v1683_v40, %v1630_v36  ;;  %v2904_v46 = vpop.f32.mrb[27].mxu1  ;;  %v1687_v48 = vmax.f32 %v1681_v38, 0.0  ;;  %v1860_v36 = vrot.slane %v3508_v47, %v669_v53 }
0x172a   :  { %v1688_v51 = vmax.f32 %v1684_v41, 0.0 }
0x172c   :  { %v1689_v54 = vpack.c.bf16 %v1688_v51, %v1687_v48 }
0x172e   :  { %2922 = vmatmul.mubr.bf16.vlgmr.msra.gmra.mrb[32].mxu0 %v1689_v54 }
0x172f   :  { %2959 = vmatprep.mubr.msk.bf16.mxu0 %vm3261_vm0, %v3260_v0 }
0x1801   :  { %v1772_v57 = vpop.f32.mrb[32].mxu0 }
0x1802   :  { %v1782_v58 = vadd.f32 %v1780_v55, %v1772_v57  ;;  %v2923_v59 = vpop.f32.mrb[33].mxu0 }
0x1803   :  { %v1775_v60 = vpop.f32.mrb[34].mxu0 }
0x1804   :  { %v1784_v44 = vadd.f32 %v1782_v58, %v1624_v31  ;;  %v1783_v52 = vadd.f32 %v1780_v55, %v1775_v60  ;;  %v2924_v45 = vpop.f32.mrb[35].mxu0  ;;  %v3207_v58 = vld [vmem:[%s3681_s1 + $0x8] sm:$0xff] }
0x1806   :  { %v1785_v61 = vadd.f32 %v1783_v52, %v1625_v32  ;;  %v1786_v62 = vsel %vm85_vm1, %v1784_v44, 0.0  ;;  %v1794_v49 = vmul.f32 %v1784_v44, %v1784_v44 }
0x1807   :  { %1787 = vadd.xlane.f32.xlu1 %v1786_v62 }
0x1808   :  { %v1789_v50 = vsel %vm85_vm1, %v1785_v61, 0.0  ;;  %v1796_v63 = vsel %vm85_vm1, %v1794_v49, 0.0  ;;  %v1795_v1 = vmul.f32 %v1785_v61, %v1785_v61 }
0x1809   :  { %1790 = vadd.xlane.f32.xlu0 %v1789_v50 }
0x180a   :  { %v1799_v2 = vsel %vm85_vm1, %v1795_v1, 0.0 }
0x180b   :  { %1797 = vadd.xlane.f32.xlu1 %v1796_v63 }
0x180f   :  { %1800 = vadd.xlane.f32.xlu1 %v1799_v2 }
0x1820   :  { %1823 = vrot.lane.b32.xlu1 %v1819_v5, %s3262_s0 }
0x1894   :  { %v1788_v11 = vpop.xlane.xlu1 %1787 }
0x1895   :  { %v1792_v12 = vmul.f32 0.03125, %v1788_v11 }
0x1896   :  { %v1791_v13 = vpop.xlane.xlu0 %1790 }
0x1897   :  { %v1804_v14 = vmul.f32 %v1792_v12, %v1792_v12  ;;  %v1793_v15 = vmul.f32 0.03125, %v1791_v13  ;;  %v1808_v25 = vsub.f32 %v1784_v44, %v1792_v12  ;;  %v3208_v44 = vld [vmem:[%s3681_s1] sm:$0xff] }
0x1898   :  { %v1798_v4 = vpop.xlane.xlu1 %1797 }
0x1899   :  { %v1802_v16 = vmul.f32 0.03125, %v1798_v4  ;;  %v1805_v24 = vmul.f32 %v1793_v15, %v1793_v15  ;;  %v1809_v28 = vsub.f32 %v1785_v61, %v1793_v15 }
0x189b   :  { %v1806_v17 = vsub.f32 %v1802_v16, %v1804_v14 }
0x189c   :  { %v1801_v23 = vpop.xlane.xlu1 %1800 }
0x189d   :  { %v1810_v18 = vadd.f32 1e-05, %v1806_v17  ;;  %v1803_v19 = vmul.f32 0.03125, %v1801_v23 }
0x189f   :  { %3183 = vrsqrt.f32 %v1810_v18  ;;  %v1807_v20 = vsub.f32 %v1803_v19, %v1805_v24  ;;  %v3125_v24 = vld [vmem:[#allocation2 + $0x160] sm:$0xff]   ;;  %v3126_v19 = vld [vmem:[#allocation2 + $0x168] sm:$0xff]  }
0x18a0   :  { %v1824_v31 = vpop.permute.xlu1 %1823 }
0x18a1   :  { %v1811_v22 = vadd.f32 1e-05, %v1807_v20 }
0x18a3   :  { %3185 = vrsqrt.f32 %v1811_v22 }
0x18a9   :  { %v3184_v26 = vpop.eup %3183 }
0x18aa   :  { %v1814_v27 = vmul.f32 %v3184_v26, %v1808_v25  ;;  %v2175_v26 = vrot.slane %v3508_v47, %v984_v42 }
0x18ac   :  { %v1820_v30 = vmul.f32 %v1819_v5, %v1814_v27 }
0x18ad   :  { %v3186_v29 = vpop.eup %3185 }
0x18ae   :  { %v1815_v9 = vmul.f32 %v3186_v29, %v1809_v28  ;;  %v3574_v33 = vadd.f32 %v1824_v31, %v1820_v30 }
0x18b0   :  { %v1821_v32 = vmul.f32 %v1819_v5, %v1815_v9 }
0x18b2   :  { %v3576_v34 = vadd.f32 %v1824_v31, %v1821_v32 }
0x18b4   :  { %v1856_v35 = vpack.c.bf16 %v3576_v34, %v3574_v33 }
0x18b6   :  { %2930 = vmatmul.mubr.msk.bf16.vlgmr.msra.gmra.mrb[28].mxu1 %vm85_vm1, %v1856_v35 }
0x1989   :  { %v1910_v37 = vpop.f32.mrb[28].mxu1 }
0x198a   :  { %v1911_v38 = vadd.f32 %v1910_v37, %v1860_v36  ;;  %v2931_v39 = vpop.f32.mrb[29].mxu1 }
0x198b   :  { %v1913_v40 = vpop.f32.mrb[30].mxu1 }
0x198c   :  { %v1914_v41 = vadd.f32 %v1913_v40, %v1860_v36  ;;  %v2932_v46 = vpop.f32.mrb[31].mxu1  ;;  %2937 = vmatprep.mubr.msk.f32.mxu1 %vm85_vm1, %v1911_v38 }
0x198d   :  { %v3130_v46 = vld [vmem:[#allocation2 + $0x188] sm:$0xff]  }
0x198e   :  { %v3071_v48 = vpack.i.bf16 %v1914_v41, %v1911_v38 }
0x1990   :  { %3072 = vrot.lane.b32.xlu0 %v3071_v48, %s3262_s0 }
0x1a02   :  { %v3073_v51 = vpop.permute.xlu0 %3072 }
0x1a03   :  { %v3075_v54 = vunpack.i.h.bf16 %v3073_v51  ;;  %v3074_v55 = vunpack.i.l.bf16 %v3073_v51  ;;  %v3132_v51 = vld [vmem:[#allocation2 + $0x198] sm:$0xff]  }
0x1a05   :  { %v3021_v57 = vpack.c.bf16 %v3075_v54, %v3074_v55  ;;  %v3133_v54 = vld [vmem:[#allocation2 + $0x1a0] sm:$0xff]   ;;  %v3134_v55 = vld [vmem:[#allocation2 + $0x1a8] sm:$0xff]  }
0x1a07   :  { %3023 = vmatprep.subr.msk.bf16.mxu1 %vm3339_vm2, %v3021_v57 }
0x1a08   :  { %3026 = vmatpush3.bf16.xpose.msk.msra.mxu1 %vm3339_vm2, %v3021_v57 }
0x1a0f   :  { %2938 = vmatmul.mubr.msk.f32.vlgmr.msra.gmra.mrb[14].mxu1 %vm85_vm1, %v1914_v41  ;;  %v3129_v41 = vld [vmem:[#allocation2 + $0x180] sm:$0xff]  }
0x1ae2   :  { %v2939_v53 = vpop.f32.mrb[14].mxu1 }
0x1ae3   :  { %v2003_v59 = vadd.f32 %v3207_v58, %v2939_v53  ;;  %v1997_v60 = vpop.f32.mrb[15].mxu1 }
0x1ae4   :  { %v1998_v52 = vadd.f32 %v3208_v44, %v1997_v60 }
0x1ae5   :  { %v2009_v45 = vsel %vm219_vm3, %v2003_v59, -inf }
0x1ae6   :  { %2010 = vmax.xlane.f32.xlu0 %v2009_v45  ;;  %v2006_v21 = vsel %vm219_vm3, %v1998_v52, -inf }
0x1ae7   :  { %2007 = vmax.xlane.f32.xlu1 %v2006_v21 }
0x1b73   :  { %v2011_v61 = vpop.xlane.xlu0 %2010 }
0x1b74   :  { %v2013_v62 = vsub.f32 %v2003_v59, %v2011_v61  ;;  %v2008_v49 = vpop.xlane.xlu1 %2007 }
0x1b75   :  { %v2012_v50 = vsub.f32 %v1998_v52, %v2008_v49 }
0x1b76   :  { %v2016_v63 = vmul.f32 1.442695, %v2013_v62 }
0x1b77   :  { %v2014_v1 = vmul.f32 1.442695, %v2012_v50 }
0x1b78   :  { %3187 = vpow2.f32 %v2016_v63 }
0x1b79   :  { %3189 = vpow2.f32 %v2014_v1 }
0x1b82   :  { %v3188_v2 = vpop.eup %3187 }
0x1b83   :  { %v3190_v5 = vpop.eup %3189  ;;  %v2021_v6 = vsel %vm219_vm3, %v3188_v2, 0.0 }
0x1b84   :  { %2022 = vadd.xlane.f32.xlu0 %v2021_v6  ;;  %v2018_v10 = vsel %vm219_vm3, %v3190_v5, 0.0 }
0x1b85   :  { %2019 = vadd.xlane.f32.xlu1 %v2018_v10 }
0x1b96   :  { %3077 = vrot.lane.b32.xlu1 %v3071_v48, %s3258_s25  ;;  %v3131_v48 = vld [vmem:[#allocation2 + $0x190] sm:$0xff]  }
0x1b9a   :  { %2211 = vrot.lane.b32.xlu1 %v2175_v26, %s3258_s25 }
0x1b9e   :  { %2374 = vrot.lane.b32.xlu1 %v2175_v26, %s3262_s0 }
0x1c11   :  { %v2023_v11 = vpop.xlane.xlu0 %2022 }
0x1c12   :  { %3191 = vrcp.f32 %v2023_v11  ;;  %v2020_v12 = vpop.xlane.xlu1 %2019 }
0x1c13   :  { %3193 = vrcp.f32 %v2020_v12 }
0x1c16   :  { %v3078_v13 = vpop.permute.xlu1 %3077 }
0x1c17   :  { %v3080_v4 = vunpack.i.h.bf16 %v3078_v13  ;;  %v3079_v14 = vunpack.i.l.bf16 %v3078_v13 }
0x1c19   :  { %v3027_v15 = vpack.c.bf16 %v3080_v4, %v3079_v14 }
0x1c1a   :  { %v2212_v6 = vpop.permute.xlu1 %2211 }
0x1c1b   :  { %3028 = vmatprep.subr.bf16.mxu1 %v3027_v15 }
0x1c1c   :  { %v3192_v16 = vpop.eup %3191  ;;  %3030 = vmatpush3.bf16.msra.mxu1 %v3027_v15 }
0x1c1d   :  { %v3194_v17 = vpop.eup %3193  ;;  %2947 = vmatprep.subr.bf16.mxu1 %v3260_v0  ;;  %v2027_v18 = vmul.f32 %v3192_v16, %v3188_v2 }
0x1c1e   :  { %v2026_v23 = vmul.f32 %v3194_v17, %v3190_v5 }
0x1c20   :  { %2944 = vmatprep.mubr.msk.f32.mxu1 %vm219_vm3, %v2026_v23  ;;  %v3135_v23 = vld [vmem:[#allocation2 + $0x1b0] sm:$0xff]  }
0x1c21   :  { %2945 = vmatmul.mubr.msk.f32.vlgmr.msra.gmra.mrb[32].mxu1 %vm219_vm3, %v2027_v18  ;;  %v2225_v18 = vrot.slane %v3508_v47, %v1034_v43 }
0x1c22   :  { %2948 = vmatpush3.bf16.msra.mxu1 %v3125_v24  ;;  %2951 = vmatprep.mubr.msk.bf16.mxu1 %vm3261_vm0, %v3260_v0  ;;  %v3136_v24 = vld [vmem:[#allocation2 + $0x1b8] sm:$0xff]  }
0x1c23   :  { %2949 = vmatprep.subr.bf16.mxu1 %v3260_v0 }
0x1c26   :  { %2950 = vmatpush3.bf16.msra.mxu1 %v3126_v19 }
0x1c27   :  { %2963 = vmatprep.subr.bf16.mxu1 %v3260_v0 }
0x1cf4   :  { %v2946_v20 = vpop.f32.mrb[32].mxu1 }
0x1cf5   :  { %v2106_v22 = vpop.f32.mrb[33].mxu1 }
0x1cf6   :  { %v2115_v25 = vpack.c.bf16 %v2946_v20, %v2106_v22 }
0x1cf8   :  { %2952 = vmatmul.mubr.msk.bf16.vlgmr.msra.gmra.mrb[36].mxu1 %vm85_vm1, %v2115_v25 }
0x1cf9   :  { %2979 = vmatprep.mubr.msk.bf16.mxu1 %vm3261_vm0, %v3260_v0  ;;  %2964 = vmatpush3.bf16.msra.mxu1 %v3129_v41 }
0x1cfa   :  { %2965 = vmatprep.subr.bf16.mxu1 %v3260_v0 }
0x1cfd   :  { %2966 = vmatpush3.bf16.msra.mxu1 %v3130_v46 }
0x1cfe   :  { %2967 = vmatprep.subr.bf16.mxu1 %v3260_v0 }
0x1d01   :  { %2968 = vmatpush3.bf16.msra.mxu1 %v3131_v48  ;;  %v2414_v48 = vrot.slane %v3508_v47, %v1223_v3 }
0x1d02   :  { %2969 = vmatprep.subr.bf16.mxu1 %v3260_v0 }
0x1d05   :  { %2970 = vmatpush3.bf16.msra.mxu1 %v3132_v51  ;;  %v3650_v51 = vld [vmem:[%s3683_s3 + $0x10] sm:$0x3]  ;;  %s3264_s3 = smov [#allocation5]  }
0x1d06   :  { %2971 = vmatprep.subr.bf16.mxu1 %v3260_v0  ;;  %s2537_s20 = sshll.u32 %s3264_s3, 4  ;;  %s2538_s20 = int_to_ptr.vmem [resolvable:$true] %s2537_s20 }
0x1d07   :  { %s3231_s21 = scalar_lea.vmem %s2538_s20, 256  ;;  %p3236_p9 = scmp.lt.s32.totalorder %s2538_s20, %s2538_s20 }
0x1d08   :  { %p3232_p8 = scmp.ne.s32.totalorder %s2538_s20, %s3231_s21  ;;  %p3237_p10 = scmp.lt.s32.totalorder %s3231_s21, %s3231_s21 }
0x1d09   :  { %2972 = vmatpush3.bf16.msra.mxu1 %v3133_v54  ;;  %v3654_v54 = vrot.slane %v3650_v51, %v3326_v8 }
0x1d0a   :  { %2973 = vmatprep.subr.bf16.mxu1 %v3260_v0  ;;  %p3238_p11 = por %p3237_p10, %p3236_p9 }
0x1d0c   :  { %p3239_p12 = pnand %p3238_p11, %p3232_p8 }
0x1d0d   :  { %2974 = vmatpush3.bf16.msra.mxu1 %v3134_v55 }
0x1d0e   :  { %2975 = vmatprep.subr.bf16.mxu1 %v3260_v0 }
0x1d11   :  { %2976 = vmatpush3.bf16.msra.mxu1 %v3135_v23  ;;  %v3138_v23 = vld [vmem:[#allocation2 + $0x1c8] sm:$0xff]  }
0x1d12   :  { %2977 = vmatprep.subr.bf16.mxu1 %v3260_v0 }
0x1d15   :  { %2978 = vmatpush3.bf16.msra.mxu1 %v3136_v24 }
0x1dcb   :  { %v2165_v27 = vpop.f32.mrb[36].mxu1 }
0x1dcc   :  { %v2176_v28 = vadd.f32 %v2175_v26, %v2165_v27  ;;  %v2953_v29 = vpop.f32.mrb[37].mxu1 }
0x1dcd   :  { %v2168_v30 = vpop.f32.mrb[38].mxu1 }
0x1dce   :  { %v2178_v9 = vadd.f32 %v2176_v28, %v3574_v33  ;;  %v2177_v31 = vadd.f32 %v2175_v26, %v2168_v30  ;;  %v2954_v32 = vpop.f32.mrb[39].mxu1  ;;  %v3127_v33 = vld [vmem:[#allocation2 + $0x170] sm:$0xff]  }
0x1dcf   :  { %2956 = vmatpush3.bf16.msra.mxu0 %v3127_v33 }
0x1dd0   :  { %v2179_v35 = vadd.f32 %v2177_v31, %v3576_v34  ;;  %v2180_v36 = vsel %vm85_vm1, %v2178_v9, 0.0  ;;  %v2188_v42 = vmul.f32 %v2178_v9, %v2178_v9  ;;  %2957 = vmatprep.subr.bf16.mxu0 %v3260_v0  ;;  %v3128_v34 = vld [vmem:[#allocation2 + $0x178] sm:$0xff]  }
0x1dd1   :  { %2181 = vadd.xlane.f32.xlu0 %v2180_v36 }
0x1dd2   :  { %v2183_v37 = vsel %vm85_vm1, %v2179_v35, 0.0  ;;  %v2190_v38 = vsel %vm85_vm1, %v2188_v42, 0.0  ;;  %v2189_v39 = vmul.f32 %v2179_v35, %v2179_v35 }
0x1dd3   :  { %2958 = vmatpush3.bf16.msra.mxu0 %v3128_v34 }
0x1dd4   :  { %v2193_v40 = vsel %vm85_vm1, %v2189_v39, 0.0  ;;  %2983 = vmatprep.subr.bf16.mxu0 %v3260_v0 }
0x1dd5   :  { %2184 = vadd.xlane.f32.xlu0 %v2183_v37 }
0x1dd9   :  { %2191 = vadd.xlane.f32.xlu0 %v2190_v38 }
0x1ddd   :  { %2194 = vadd.xlane.f32.xlu0 %v2193_v40 }
0x1df3   :  { %2216 = vrot.lane.b32.xlu0 %v2175_v26, %s3263_s12 }
0x1e5e   :  { %v2182_v57 = vpop.xlane.xlu0 %2181 }
0x1e5f   :  { %v2186_v58 = vmul.f32 0.03125, %v2182_v57 }
0x1e61   :  { %v2198_v60 = vmul.f32 %v2186_v58, %v2186_v58  ;;  %v2202_v1 = vsub.f32 %v2178_v9, %v2186_v58  ;;  %v2375_v9 = vpop.permute.xlu1 %2374 }
0x1e62   :  { %v2185_v53 = vpop.xlane.xlu0 %2184 }
0x1e63   :  { %v2187_v44 = vmul.f32 0.03125, %v2185_v53 }
0x1e65   :  { %v2199_v61 = vmul.f32 %v2187_v44, %v2187_v44  ;;  %v2203_v10 = vsub.f32 %v2179_v35, %v2187_v44 }
0x1e66   :  { %v2192_v59 = vpop.xlane.xlu0 %2191 }
0x1e67   :  { %v2196_v52 = vmul.f32 0.03125, %v2192_v59 }
0x1e69   :  { %v2200_v45 = vsub.f32 %v2196_v52, %v2198_v60 }
0x1e6a   :  { %v2195_v21 = vpop.xlane.xlu0 %2194 }
0x1e6b   :  { %v2204_v62 = vadd.f32 1e-05, %v2200_v45  ;;  %v2197_v49 = vmul.f32 0.03125, %v2195_v21 }
0x1e6d   :  { %3195 = vrsqrt.f32 %v2204_v62  ;;  %v2201_v50 = vsub.f32 %v2197_v49, %v2199_v61 }
0x1e6e   :  { %v2217_v4 = vpop.permute.xlu0 %2216 }
0x1e6f   :  { %v2205_v63 = vadd.f32 1e-05, %v2201_v50 }
0x1e71   :  { %3197 = vrsqrt.f32 %v2205_v63 }
0x1e77   :  { %v3196_v2 = vpop.eup %3195 }
0x1e78   :  { %v2208_v5 = vmul.f32 %v3196_v2, %v2202_v1 }
0x1e7a   :  { %v2214_v13 = vmul.f32 %v2212_v6, %v2208_v5 }
0x1e7b   :  { %v3198_v11 = vpop.eup %3197 }
0x1e7c   :  { %v2209_v12 = vmul.f32 %v3198_v11, %v2203_v10  ;;  %v2219_v15 = vadd.f32 %v2217_v4, %v2214_v13 }
0x1e7e   :  { %v2215_v14 = vmul.f32 %v2212_v6, %v2209_v12 }
0x1e80   :  { %v2220_v16 = vadd.f32 %v2217_v4, %v2215_v14 }
0x1e82   :  { %v2221_v17 = vpack.c.bf16 %v2220_v16, %v2219_v15 }
0x1e84   :  { %2960 = vmatmul.mubr.msk.bf16.vlgmr.msra.gmra.mrb[36].mxu0 %vm85_vm1, %v2221_v17  ;;  %v3137_v17 = vld [vmem:[#allocation2 + $0x1c0] sm:$0xff]  }
0x1e85   :  { %2987 = vmatprep.mubr.msk.bf16.mxu0 %vm3261_vm0, %v3260_v0  ;;  %2984 = vmatpush3.bf16.msra.mxu0 %v3137_v17 }
0x1e86   :  { %2985 = vmatprep.subr.bf16.mxu0 %v3260_v0 }
0x1e89   :  { %2986 = vmatpush3.bf16.msra.mxu0 %v3138_v23 }
0x1f57   :  { %v2275_v19 = vpop.f32.mrb[36].mxu0 }
0x1f58   :  { %v2276_v20 = vadd.f32 %v2275_v19, %v2225_v18  ;;  %v2961_v22 = vpop.f32.mrb[37].mxu0 }
0x1f59   :  { %v2278_v25 = vpop.f32.mrb[38].mxu0 }
0x1f5a   :  { %v2279_v26 = vadd.f32 %v2278_v25, %v2225_v18  ;;  %v2962_v27 = vpop.f32.mrb[39].mxu0  ;;  %v2282_v28 = vmax.f32 %v2276_v20, 0.0 }
0x1f5c   :  { %v2283_v29 = vmax.f32 %v2279_v26, 0.0 }
0x1f5e   :  { %v2284_v30 = vpack.c.bf16 %v2283_v29, %v2282_v28 }
0x1f60   :  { %2980 = vmatmul.mubr.bf16.vlgmr.msra.gmra.mrb[40].mxu1 %v2284_v30 }
0x2033   :  { %v2367_v31 = vpop.f32.mrb[40].mxu1 }
0x2034   :  { %v2377_v32 = vadd.f32 %v2375_v9, %v2367_v31  ;;  %v2981_v35 = vpop.f32.mrb[41].mxu1 }
0x2035   :  { %v2370_v36 = vpop.f32.mrb[42].mxu1 }
0x2036   :  { %v2379_v37 = vadd.f32 %v2377_v32, %v2219_v15  ;;  %v2378_v42 = vadd.f32 %v2375_v9, %v2370_v36  ;;  %v2982_v38 = vpop.f32.mrb[43].mxu1 }
0x2038   :  { %v2380_v39 = vadd.f32 %v2378_v42, %v2220_v16  ;;  %v2381_v43 = vsel %vm85_vm1, %v2379_v37, 0.0  ;;  %v2389_v40 = vmul.f32 %v2379_v37, %v2379_v37 }
0x2039   :  { %2382 = vadd.xlane.f32.xlu1 %v2381_v43 }
0x203a   :  { %v2384_v33 = vsel %vm85_vm1, %v2380_v39, 0.0  ;;  %v2391_v34 = vsel %vm85_vm1, %v2389_v40, 0.0  ;;  %v2390_v41 = vmul.f32 %v2380_v39, %v2380_v39 }
0x203b   :  { %2385 = vadd.xlane.f32.xlu0 %v2384_v33 }
0x203c   :  { %v2394_v46 = vsel %vm85_vm1, %v2390_v41, 0.0 }
0x203d   :  { %2392 = vadd.xlane.f32.xlu1 %v2391_v34 }
0x2041   :  { %2395 = vadd.xlane.f32.xlu1 %v2394_v46  ;;  %v2473_v46 = vrot.slane %v3650_v51, %v3379_v56 }
0x2052   :  { %2418 = vrot.lane.b32.xlu1 %v2414_v48, %s3262_s0 }
0x2056   :  { %2460 = vrot.lane.b32.xlu1 %v3654_v54, %s3262_s0 }
0x20c6   :  { %v2383_v55 = vpop.xlane.xlu1 %2382 }
0x20c7   :  { %v2387_v57 = vmul.f32 0.03125, %v2383_v55 }
0x20c8   :  { %v2386_v53 = vpop.xlane.xlu0 %2385 }
0x20c9   :  { %v2399_v58 = vmul.f32 %v2387_v57, %v2387_v57  ;;  %v2388_v3 = vmul.f32 0.03125, %v2386_v53  ;;  %v2403_v8 = vsub.f32 %v2379_v37, %v2387_v57 }
0x20ca   :  { %v2393_v7 = vpop.xlane.xlu1 %2392 }
0x20cb   :  { %v2397_v47 = vmul.f32 0.03125, %v2393_v7  ;;  %v2400_v44 = vmul.f32 %v2388_v3, %v2388_v3  ;;  %v2404_v63 = vsub.f32 %v2380_v39, %v2388_v3 }
0x20cd   :  { %v2401_v59 = vsub.f32 %v2397_v47, %v2399_v58 }
0x20ce   :  { %v2396_v60 = vpop.xlane.xlu1 %2395 }
0x20cf   :  { %v2405_v52 = vadd.f32 1e-05, %v2401_v59  ;;  %v2398_v45 = vmul.f32 0.03125, %v2396_v60 }
0x20d1   :  { %3199 = vrsqrt.f32 %v2405_v52  ;;  %v2402_v21 = vsub.f32 %v2398_v45, %v2400_v44 }
0x20d2   :  { %v2419_v50 = vpop.permute.xlu1 %2418 }
0x20d3   :  { %v2406_v61 = vadd.f32 1e-05, %v2402_v21 }
0x20d5   :  { %3201 = vrsqrt.f32 %v2406_v61 }
0x20d6   :  { %v2461_v43 = vpop.permute.xlu1 %2460 }
0x20db   :  { %v3200_v62 = vpop.eup %3199 }
0x20dc   :  { %v2409_v49 = vmul.f32 %v3200_v62, %v2403_v8 }
0x20de   :  { %v2415_v1 = vmul.f32 %v2414_v48, %v2409_v49 }
0x20df   :  { %v3202_v2 = vpop.eup %3201 }
0x20e0   :  { %v2410_v5 = vmul.f32 %v3202_v2, %v2404_v63  ;;  %v2421_v6 = vadd.f32 %v2419_v50, %v2415_v1 }
0x20e2   :  { %v2416_v10 = vmul.f32 %v2414_v48, %v2410_v5  ;;  %v2423_v11 = vsel %vm85_vm1, %v2421_v6, 0.0  ;;  %v2431_v4 = vmul.f32 %v2421_v6, %v2421_v6 }
0x20e3   :  { %2424 = vadd.xlane.f32.xlu0 %v2423_v11 }
0x20e4   :  { %v2422_v12 = vadd.f32 %v2419_v50, %v2416_v10  ;;  %v2433_v14 = vsel %vm85_vm1, %v2431_v4, 0.0 }
0x20e6   :  { %v2426_v13 = vsel %vm85_vm1, %v2422_v12, 0.0  ;;  %v2432_v15 = vmul.f32 %v2422_v12, %v2422_v12 }
0x20e7   :  { %2427 = vadd.xlane.f32.xlu0 %v2426_v13 }
0x20e8   :  { %v2436_v16 = vsel %vm85_vm1, %v2432_v15, 0.0 }
0x20eb   :  { %2434 = vadd.xlane.f32.xlu0 %v2433_v14 }
0x20ef   :  { %2437 = vadd.xlane.f32.xlu0 %v2436_v16 }
0x2170   :  { %v2425_v24 = vpop.xlane.xlu0 %2424 }
0x2171   :  { %v2429_v19 = vmul.f32 0.03125, %v2425_v24 }
0x2173   :  { %v2441_v22 = vmul.f32 %v2429_v19, %v2429_v19  ;;  %v2445_v35 = vsub.f32 %v2421_v6, %v2429_v19 }
0x2174   :  { %v2428_v18 = vpop.xlane.xlu0 %2427 }
0x2175   :  { %v2430_v25 = vmul.f32 0.03125, %v2428_v18 }
0x2177   :  { %v2442_v29 = vmul.f32 %v2430_v25, %v2430_v25  ;;  %v2446_v37 = vsub.f32 %v2422_v12, %v2430_v25 }
0x2178   :  { %v2435_v20 = vpop.xlane.xlu0 %2434 }
0x2179   :  { %v2439_v26 = vmul.f32 0.03125, %v2435_v20 }
0x217b   :  { %v2443_v27 = vsub.f32 %v2439_v26, %v2441_v22 }
0x217c   :  { %v2438_v28 = vpop.xlane.xlu0 %2437 }
0x217d   :  { %v2447_v30 = vadd.f32 1e-05, %v2443_v27  ;;  %v2440_v9 = vmul.f32 0.03125, %v2438_v28 }
0x217f   :  { %3203 = vrsqrt.f32 %v2447_v30  ;;  %v2444_v31 = vsub.f32 %v2440_v9, %v2442_v29 }
0x2181   :  { %v2448_v32 = vadd.f32 1e-05, %v2444_v31 }
0x2183   :  { %3205 = vrsqrt.f32 %v2448_v32 }
0x2189   :  { %v3204_v0 = vpop.eup %3203 }
0x218a   :  { %v2451_v36 = vmul.f32 %v3204_v0, %v2445_v35 }
0x218c   :  { %v2457_v39 = vmul.f32 %v3654_v54, %v2451_v36 }
0x218d   :  { %v3206_v42 = vpop.eup %3205 }
0x218e   :  { %v2452_v38 = vmul.f32 %v3206_v42, %v2446_v37  ;;  %v2463_v33 = vadd.f32 %v2461_v43, %v2457_v39 }
0x2190   :  { %v2458_v40 = vmul.f32 %v3654_v54, %v2452_v38 }
0x2192   :  { %v2464_v34 = vadd.f32 %v2461_v43, %v2458_v40 }
0x2194   :  { %v2469_v41 = vpack.c.bf16 %v2464_v34, %v2463_v33 }
0x2196   :  { %2988 = vmatmul.mubr.msk.bf16.vlgmr.msra.gmra.mrb[40].mxu0 %vm85_vm1, %v2469_v41 }
0x2269   :  { %v2523_v48 = vpop.f32.mrb[40].mxu0 }
0x226a   :  { %v2524_v55 = vadd.f32 %v2523_v48, %v2473_v46  ;;  %v2989_v57 = vpop.f32.mrb[41].mxu0 }
0x226b   :  { %v2526_v53 = vpop.f32.mrb[42].mxu0 }
0x226c   :  { %2530 = vst [vmem:[#allocation5] sm:$0xff] %v2524_v55  ;;  %v2527_v7 = vadd.f32 %v2526_v53, %v2473_v46  ;;  %v2990_v58 = vpop.f32.mrb[43].mxu0 }
0x226e   :  { %2531 = vst [vmem:[#allocation5 + $0x8] sm:$0xff] %v2527_v7 }
0x226f   :  { %3242 = shalt.err (!%p3239_p12)
}
0x2270   :  { %s3243_s24 = scalar_lea.hbm %s3684_s4, 256 }
0x2271   :  { %p3244_p13 = scmp.ne.s32.totalorder %s3684_s4, %s3243_s24  ;;  %p3247_p0 = scmp.lt.u32.totalorder %s3243_s24, %s3684_s4 }
0x2273   :  { %p3249_p1 = pnand %p3247_p0, %p3244_p13 }
0x2275   :  { %3252 = shalt.err (!%p3249_p1)
}
0x2276   :  { %s3265_s29 = smov 128   ;;  %s3266_s30 = smov 8  }
0x2277   :  { %2543 = dma.vmem_to_hbm [thread:$0]  %s2538_s20, 256, %s3684_s4, [#allocation4], %s3265_s29, %s3265_s29, %s3266_s30  }
0x2278   :  { %3255 = dma.done.wait [#allocation4], 256  }
0x2279   :  { %3256 = vsyncadd [#allocation4], 4294967040 }
0x227a   :  { %2547 = vsyncpa [#allocation3], 1 }
0x227b   :  { %2548 = vsyncpa [#allocation4], 1 }

</bundles_post_ra>
